<compile_context>
chip_gen: v6e
topology: v6e:2x2x1
jax: 0.10.0
libtpu: 0.0.40
codegen_flags: <defaults>
</compile_context>

<pallas_src>
import functools

import jax
import jax.numpy as jnp
from jax import lax
from jax.experimental import pallas as pl
from jax.experimental.pallas import tpu as pltpu


def _residual_kernel(xwin_ref, x_ref, w1_ref, w2_ref, out_ref, *,
                     group_k: bool, flatten_m: bool):
    # xwin_ref: (1, tH+2, W+2, C)  padded rows for this tile (incl. 2-row halo)
    # x_ref:    (1, tH,   W,   C)  un-padded rows (residual branch)
    # w1_ref:   (3, 3C, R) if group_k else (9, C, R)
    # w2_ref:   (R, Cout)
    # out_ref:  (1, tH, W, Cout)
    tH, W, Cout = out_ref.shape[1], out_ref.shape[2], out_ref.shape[3]
    C = x_ref.shape[3]
    M = tH * W

    xw = xwin_ref[0]                               # (tH+2, W+2, C), native dtype
    # Three W-shifted copies (the only sublane-misaligned slices).  The ky taps
    # below are cheap tile-aligned outer-row slices of these.
    sh = [xw[:, kx:kx + W, :] for kx in range(3)]  # each (tH+2, W, C)

    if flatten_m:
        def flat(a):
            return a.reshape(M, a.shape[-1])       # lane dim preserved -> cheap
        dims = (((1,), (0,)), ((), ()))
    else:
        def flat(a):
            return a
        dims = (((2,), (0,)), ((), ()))

    acc = None                                     # f32 accumulator
    if group_k:
        # Pack the 3 kx taps along K: one (M, 3C) x (3C, R) dot per ky.
        big = jnp.concatenate(sh, axis=-1)         # (tH+2, W, 3C)
        for ky in range(3):
            d = lax.dot_general(flat(big[ky:ky + tH]), w1_ref[ky],
                                dimension_numbers=dims,
                                preferred_element_type=jnp.float32)
            acc = d if acc is None else acc + d
    else:
        for ky in range(3):
            for kx in range(3):
                d = lax.dot_general(flat(sh[kx][ky:ky + tH]),
                                    w1_ref[ky * 3 + kx],
                                    dimension_numbers=dims,
                                    preferred_element_type=jnp.float32)
                acc = d if acc is None else acc + d

    h = jnp.maximum(acc, 0.0).astype(w2_ref.dtype)           # ReLU after conv3x3
    y = lax.dot_general(h, w2_ref[...], dimension_numbers=dims,
                        preferred_element_type=jnp.float32)  # 1x1 conv
    y = jnp.maximum(y, 0.0)                                   # ReLU after conv1x1

    res = flat(x_ref[0]).astype(jnp.float32)                  # aligned residual
    out = res + y
    if flatten_m:
        out = out.reshape(tH, W, Cout)
    out_ref[0] = out.astype(out_ref.dtype)


def _pick_row_tile(H, W, C, R, Cout, itemsize,
                   vmem_budget_bytes=8 * 1024 * 1024, max_rows=256):
    """Largest divisor of H whose per-step working set fits the VMEM budget."""
    def est(t):
        blocks = ((t + 2) * (W + 2) * C + t * W * C + t * W * Cout) * itemsize
        interm = 3 * (t + 2) * W * C * itemsize          # shifted kx copies
        interm += t * W * (2 * R + Cout) * 4             # acc/h + y in f32
        return 2 * blocks + interm                       # blocks double-buffered
    best = 1
    for t in range(1, H + 1):
        if H % t == 0 and t <= max_rows and est(t) <= vmem_budget_bytes:
            best = t
    return best


def residual_forward(x_nchw, w1, w2, *, row_tile=None):
    """x_nchw: (N, C, H, W); w1: (R, C, 3, 3); w2: (Cout, R, 1, 1) -> NCHW out."""
    N, C, H, W = x_nchw.shape
    R = w1.shape[0]
    Cout = w2.shape[0]
    assert Cout == C, "residual add requires num_hiddens == in_channels"
    assert w1.shape == (R, C, 3, 3) and w2.shape == (Cout, R, 1, 1)

    dtype = x_nchw.dtype
    # Feed the MXU in the activation dtype; accumulation is f32 in-kernel.
    w1 = w1.astype(dtype)
    w2 = w2.astype(dtype)

    if row_tile is None:
        row_tile = _pick_row_tile(H, W, C, R, Cout, jnp.dtype(dtype).itemsize)
    assert H % row_tile == 0, "row_tile must divide H"
    tH = row_tile
    nT = H // tH

    group_k = (C % 128 == 0)      # aligned lane-concat only (K = 3C)
    flatten_m = (W % 8 == 0)      # (tH, W) -> M merge stays sublane-tile aligned

    # ---- wrapper-side layout plumbing (NCHW -> NHWC, halo windows, weights) ----
    x = jnp.transpose(x_nchw, (0, 2, 3, 1))                       # (N, H, W, C)
    xpad = jnp.pad(x, ((0, 0), (1, 1), (1, 1), (0, 0)))           # SAME padding
    # Overlapping row windows (2-row halo), stacked so Pallas blocks don't overlap.
    xwin = jnp.stack([xpad[:, i * tH:i * tH + tH + 2] for i in range(nT)], axis=1)
    xwin = xwin.reshape(N * nT, tH + 2, W + 2, C)

    w1t = jnp.transpose(w1, (2, 3, 1, 0))                         # (ky, kx, C, R)
    w1p = w1t.reshape(3, 3 * C, R) if group_k else w1t.reshape(9, C, R)
    w2m = jnp.transpose(w2[:, :, 0, 0], (1, 0))                   # (R, Cout)

    kernel = functools.partial(_residual_kernel, group_k=group_k,
                               flatten_m=flatten_m)

    out_nhwc = pl.pallas_call(
        kernel,
        out_shape=jax.ShapeDtypeStruct((N, H, W, Cout), dtype),
        grid_spec=pltpu.PrefetchScalarGridSpec(
            num_scalar_prefetch=0,
            grid=(N, nT),
            in_specs=[
                pl.BlockSpec((1, tH + 2, W + 2, C),
                             lambda n, i: (n * nT + i, 0, 0, 0)),
                pl.BlockSpec((1, tH, W, C), lambda n, i: (n, i, 0, 0)),
                # Weights are tiny; per-step re-DMA is an accepted trade-off.
                pl.BlockSpec(w1p.shape, lambda n, i: (0, 0, 0)),
                pl.BlockSpec(w2m.shape, lambda n, i: (0, 0)),
            ],
            out_specs=pl.BlockSpec((1, tH, W, Cout), lambda n, i: (n, i, 0, 0)),
        ),
        compiler_params=pltpu.CompilerParams(
            dimension_semantics=("parallel", "parallel"),
            vmem_limit_bytes=32 * 1024 * 1024,
        ),
    )(xwin, x, w1p, w2m)

    return jnp.transpose(out_nhwc, (0, 3, 1, 2))                  # back to NCHW


def residual_reference(x_nchw, w1, w2):
    """Pure-JAX reference (lax convs, NCHW) matching the PyTorch module."""
    dn = ("NCHW", "OIHW", "NCHW")
    h = lax.conv_general_dilated(x_nchw, w1, (1, 1), "SAME", dimension_numbers=dn)
    h = jnp.maximum(h, 0.0)
    y = lax.conv_general_dilated(h, w2, (1, 1), "VALID", dimension_numbers=dn)
    y = jnp.maximum(y, 0.0)
    return x_nchw + y


if __name__ == "__main__":
    # Residual add requires num_hiddens == in_channels.
    N, C, H, W = 2, 4, 16, 16          # in_channels = num_hiddens = 4
    R = 8                              # num_residual_hiddens

    key = jax.random.PRNGKey(0)
    kx_, k1, k2 = jax.random.split(key, 3)
    x = jax.random.normal(kx_, (N, C, H, W), dtype=jnp.float32)
    # Conv2d weight shapes: (out, in, kh, kw), bias=False.
    w1 = 0.1 * jax.random.normal(k1, (R, C, 3, 3), dtype=jnp.float32)
    w2 = 0.1 * jax.random.normal(k2, (C, R, 1, 1), dtype=jnp.float32)

    # row_tile=8 -> grid (2, 2): exercises the halo'd row-tiling path.
    out = jax.block_until_ready(residual_forward(x, w1, w2, row_tile=8))
    ref = jax.block_until_ready(residual_reference(x, w1, w2))

    assert out.shape == (N, C, H, W)
    assert jnp.allclose(out, ref, atol=1e-4, rtol=1e-4), "mismatch vs reference"
    print("KERNEL_OK")
</pallas_src>

<mosaic_0001>
module attributes {stable_mosaic.version = 11 : i64} {
  func.func @_residual_kernel(%arg0: i32, %arg1: i32, %arg2: memref<1x10x18x4xf32, #tpu.memory_space<vmem>>, %arg3: memref<1x8x16x4xf32, #tpu.memory_space<vmem>>, %arg4: memref<9x4x8xf32, #tpu.memory_space<vmem>>, %arg5: memref<8x4xf32, #tpu.memory_space<vmem>>, %arg6: memref<1x8x16x4xf32, #tpu.memory_space<vmem>>) attributes {dimension_semantics = [#tpu.dimension_semantics<parallel>, #tpu.dimension_semantics<parallel>], iteration_bounds = array<i64: 2, 2>, scalar_prefetch = 0 : i64, scratch_operands = 0 : i64, tpu.core_type = #tpu.core_type<tc>, window_params = [{transform_indices = @transform_0, window_bounds = array<i64: 1, 10, 18, 4>}, {transform_indices = @transform_1, window_bounds = array<i64: 1, 8, 16, 4>}, {pipeline_mode = #tpu.pipeline_mode<synchronous>, transform_indices = @transform_2, window_bounds = array<i64: 9, 4, 8>}, {pipeline_mode = #tpu.pipeline_mode<synchronous>, transform_indices = @transform_3, window_bounds = array<i64: 8, 4>}, {transform_indices = @transform_4, window_bounds = array<i64: 1, 8, 16, 4>}]} {
    %c0 = arith.constant 0 : index
    %c0_0 = arith.constant 0 : index
    %c0_1 = arith.constant 0 : index
    %c0_2 = arith.constant 0 : index
    %0 = vector.load %arg2[%c0, %c0_0, %c0_1, %c0_2] : memref<1x10x18x4xf32, #tpu.memory_space<vmem>>, vector<1x10x18x4xf32>
    %1 = vector.shape_cast %0 : vector<1x10x18x4xf32> to vector<10x18x4xf32>
    %2 = vector.extract_strided_slice %1 {offsets = [0, 0, 0], sizes = [10, 16, 4], strides = [1, 1, 1]} : vector<10x18x4xf32> to vector<10x16x4xf32>
    %3 = vector.extract_strided_slice %1 {offsets = [0, 1, 0], sizes = [10, 16, 4], strides = [1, 1, 1]} : vector<10x18x4xf32> to vector<10x16x4xf32>
    %4 = vector.extract_strided_slice %1 {offsets = [0, 2, 0], sizes = [10, 16, 4], strides = [1, 1, 1]} : vector<10x18x4xf32> to vector<10x16x4xf32>
    %5 = vector.extract_strided_slice %2 {offsets = [0, 0, 0], sizes = [8, 16, 4], strides = [1, 1, 1]} : vector<10x16x4xf32> to vector<8x16x4xf32>
    %6 = vector.shape_cast %5 : vector<8x16x4xf32> to vector<128x4xf32>
    %c0_3 = arith.constant 0 : index
    %c0_4 = arith.constant 0 : index
    %c0_5 = arith.constant 0 : index
    %7 = vector.load %arg4[%c0_3, %c0_4, %c0_5] : memref<9x4x8xf32, #tpu.memory_space<vmem>>, vector<1x4x8xf32>
    %8 = vector.shape_cast %7 : vector<1x4x8xf32> to vector<4x8xf32>
    %cst = arith.constant dense<0.000000e+00> : vector<128x8xf32>
    %9 = tpu.matmul %6, %8, %cst {dimension_numbers = #tpu.dot_dimension_numbers<[1], [0], [0], [1], [0, 0, 1, 1], [], []>} : vector<128x4xf32>, vector<4x8xf32>, vector<128x8xf32> -> vector<128x8xf32>
    %10 = vector.extract_strided_slice %3 {offsets = [0, 0, 0], sizes = [8, 16, 4], strides = [1, 1, 1]} : vector<10x16x4xf32> to vector<8x16x4xf32>
    %11 = vector.shape_cast %10 : vector<8x16x4xf32> to vector<128x4xf32>
    %c1 = arith.constant 1 : index
    %c0_6 = arith.constant 0 : index
    %c0_7 = arith.constant 0 : index
    %12 = vector.load %arg4[%c1, %c0_6, %c0_7] : memref<9x4x8xf32, #tpu.memory_space<vmem>>, vector<1x4x8xf32>
    %13 = vector.shape_cast %12 : vector<1x4x8xf32> to vector<4x8xf32>
    %cst_8 = arith.constant dense<0.000000e+00> : vector<128x8xf32>
    %14 = tpu.matmul %11, %13, %cst_8 {dimension_numbers = #tpu.dot_dimension_numbers<[1], [0], [0], [1], [0, 0, 1, 1], [], []>} : vector<128x4xf32>, vector<4x8xf32>, vector<128x8xf32> -> vector<128x8xf32>
    %15 = arith.addf %9, %14 : vector<128x8xf32>
    %16 = vector.extract_strided_slice %4 {offsets = [0, 0, 0], sizes = [8, 16, 4], strides = [1, 1, 1]} : vector<10x16x4xf32> to vector<8x16x4xf32>
    %17 = vector.shape_cast %16 : vector<8x16x4xf32> to vector<128x4xf32>
    %c2 = arith.constant 2 : index
    %c0_9 = arith.constant 0 : index
    %c0_10 = arith.constant 0 : index
    %18 = vector.load %arg4[%c2, %c0_9, %c0_10] : memref<9x4x8xf32, #tpu.memory_space<vmem>>, vector<1x4x8xf32>
    %19 = vector.shape_cast %18 : vector<1x4x8xf32> to vector<4x8xf32>
    %cst_11 = arith.constant dense<0.000000e+00> : vector<128x8xf32>
    %20 = tpu.matmul %17, %19, %cst_11 {dimension_numbers = #tpu.dot_dimension_numbers<[1], [0], [0], [1], [0, 0, 1, 1], [], []>} : vector<128x4xf32>, vector<4x8xf32>, vector<128x8xf32> -> vector<128x8xf32>
    %21 = arith.addf %15, %20 : vector<128x8xf32>
    %22 = vector.extract_strided_slice %2 {offsets = [1, 0, 0], sizes = [8, 16, 4], strides = [1, 1, 1]} : vector<10x16x4xf32> to vector<8x16x4xf32>
    %23 = vector.shape_cast %22 : vector<8x16x4xf32> to vector<128x4xf32>
    %c3 = arith.constant 3 : index
    %c0_12 = arith.constant 0 : index
    %c0_13 = arith.constant 0 : index
    %24 = vector.load %arg4[%c3, %c0_12, %c0_13] : memref<9x4x8xf32, #tpu.memory_space<vmem>>, vector<1x4x8xf32>
    %25 = vector.shape_cast %24 : vector<1x4x8xf32> to vector<4x8xf32>
    %cst_14 = arith.constant dense<0.000000e+00> : vector<128x8xf32>
    %26 = tpu.matmul %23, %25, %cst_14 {dimension_numbers = #tpu.dot_dimension_numbers<[1], [0], [0], [1], [0, 0, 1, 1], [], []>} : vector<128x4xf32>, vector<4x8xf32>, vector<128x8xf32> -> vector<128x8xf32>
    %27 = arith.addf %21, %26 : vector<128x8xf32>
    %28 = vector.extract_strided_slice %3 {offsets = [1, 0, 0], sizes = [8, 16, 4], strides = [1, 1, 1]} : vector<10x16x4xf32> to vector<8x16x4xf32>
    %29 = vector.shape_cast %28 : vector<8x16x4xf32> to vector<128x4xf32>
    %c4 = arith.constant 4 : index
    %c0_15 = arith.constant 0 : index
    %c0_16 = arith.constant 0 : index
    %30 = vector.load %arg4[%c4, %c0_15, %c0_16] : memref<9x4x8xf32, #tpu.memory_space<vmem>>, vector<1x4x8xf32>
    %31 = vector.shape_cast %30 : vector<1x4x8xf32> to vector<4x8xf32>
    %cst_17 = arith.constant dense<0.000000e+00> : vector<128x8xf32>
    %32 = tpu.matmul %29, %31, %cst_17 {dimension_numbers = #tpu.dot_dimension_numbers<[1], [0], [0], [1], [0, 0, 1, 1], [], []>} : vector<128x4xf32>, vector<4x8xf32>, vector<128x8xf32> -> vector<128x8xf32>
    %33 = arith.addf %27, %32 : vector<128x8xf32>
    %34 = vector.extract_strided_slice %4 {offsets = [1, 0, 0], sizes = [8, 16, 4], strides = [1, 1, 1]} : vector<10x16x4xf32> to vector<8x16x4xf32>
    %35 = vector.shape_cast %34 : vector<8x16x4xf32> to vector<128x4xf32>
    %c5 = arith.constant 5 : index
    %c0_18 = arith.constant 0 : index
    %c0_19 = arith.constant 0 : index
    %36 = vector.load %arg4[%c5, %c0_18, %c0_19] : memref<9x4x8xf32, #tpu.memory_space<vmem>>, vector<1x4x8xf32>
    %37 = vector.shape_cast %36 : vector<1x4x8xf32> to vector<4x8xf32>
    %cst_20 = arith.constant dense<0.000000e+00> : vector<128x8xf32>
    %38 = tpu.matmul %35, %37, %cst_20 {dimension_numbers = #tpu.dot_dimension_numbers<[1], [0], [0], [1], [0, 0, 1, 1], [], []>} : vector<128x4xf32>, vector<4x8xf32>, vector<128x8xf32> -> vector<128x8xf32>
    %39 = arith.addf %33, %38 : vector<128x8xf32>
    %40 = vector.extract_strided_slice %2 {offsets = [2, 0, 0], sizes = [8, 16, 4], strides = [1, 1, 1]} : vector<10x16x4xf32> to vector<8x16x4xf32>
    %41 = vector.shape_cast %40 : vector<8x16x4xf32> to vector<128x4xf32>
    %c6 = arith.constant 6 : index
    %c0_21 = arith.constant 0 : index
    %c0_22 = arith.constant 0 : index
    %42 = vector.load %arg4[%c6, %c0_21, %c0_22] : memref<9x4x8xf32, #tpu.memory_space<vmem>>, vector<1x4x8xf32>
    %43 = vector.shape_cast %42 : vector<1x4x8xf32> to vector<4x8xf32>
    %cst_23 = arith.constant dense<0.000000e+00> : vector<128x8xf32>
    %44 = tpu.matmul %41, %43, %cst_23 {dimension_numbers = #tpu.dot_dimension_numbers<[1], [0], [0], [1], [0, 0, 1, 1], [], []>} : vector<128x4xf32>, vector<4x8xf32>, vector<128x8xf32> -> vector<128x8xf32>
    %45 = arith.addf %39, %44 : vector<128x8xf32>
    %46 = vector.extract_strided_slice %3 {offsets = [2, 0, 0], sizes = [8, 16, 4], strides = [1, 1, 1]} : vector<10x16x4xf32> to vector<8x16x4xf32>
    %47 = vector.shape_cast %46 : vector<8x16x4xf32> to vector<128x4xf32>
    %c7 = arith.constant 7 : index
    %c0_24 = arith.constant 0 : index
    %c0_25 = arith.constant 0 : index
    %48 = vector.load %arg4[%c7, %c0_24, %c0_25] : memref<9x4x8xf32, #tpu.memory_space<vmem>>, vector<1x4x8xf32>
    %49 = vector.shape_cast %48 : vector<1x4x8xf32> to vector<4x8xf32>
    %cst_26 = arith.constant dense<0.000000e+00> : vector<128x8xf32>
    %50 = tpu.matmul %47, %49, %cst_26 {dimension_numbers = #tpu.dot_dimension_numbers<[1], [0], [0], [1], [0, 0, 1, 1], [], []>} : vector<128x4xf32>, vector<4x8xf32>, vector<128x8xf32> -> vector<128x8xf32>
    %51 = arith.addf %45, %50 : vector<128x8xf32>
    %52 = vector.extract_strided_slice %4 {offsets = [2, 0, 0], sizes = [8, 16, 4], strides = [1, 1, 1]} : vector<10x16x4xf32> to vector<8x16x4xf32>
    %53 = vector.shape_cast %52 : vector<8x16x4xf32> to vector<128x4xf32>
    %c8 = arith.constant 8 : index
    %c0_27 = arith.constant 0 : index
    %c0_28 = arith.constant 0 : index
    %54 = vector.load %arg4[%c8, %c0_27, %c0_28] : memref<9x4x8xf32, #tpu.memory_space<vmem>>, vector<1x4x8xf32>
    %55 = vector.shape_cast %54 : vector<1x4x8xf32> to vector<4x8xf32>
    %cst_29 = arith.constant dense<0.000000e+00> : vector<128x8xf32>
    %56 = tpu.matmul %53, %55, %cst_29 {dimension_numbers = #tpu.dot_dimension_numbers<[1], [0], [0], [1], [0, 0, 1, 1], [], []>} : vector<128x4xf32>, vector<4x8xf32>, vector<128x8xf32> -> vector<128x8xf32>
    %57 = arith.addf %51, %56 : vector<128x8xf32>
    %cst_30 = arith.constant 0.000000e+00 : f32
    %58 = vector.broadcast %cst_30 : f32 to vector<128x8xf32>
    %59 = arith.maximumf %57, %58 : vector<128x8xf32>
    %c0_31 = arith.constant 0 : index
    %c0_32 = arith.constant 0 : index
    %60 = vector.load %arg5[%c0_31, %c0_32] : memref<8x4xf32, #tpu.memory_space<vmem>>, vector<8x4xf32>
    %cst_33 = arith.constant dense<0.000000e+00> : vector<128x4xf32>
    %61 = tpu.matmul %59, %60, %cst_33 {dimension_numbers = #tpu.dot_dimension_numbers<[1], [0], [0], [1], [0, 0, 1, 1], [], []>} : vector<128x8xf32>, vector<8x4xf32>, vector<128x4xf32> -> vector<128x4xf32>
    %cst_34 = arith.constant 0.000000e+00 : f32
    %62 = vector.broadcast %cst_34 : f32 to vector<128x4xf32>
    %63 = arith.maximumf %61, %62 : vector<128x4xf32>
    %c0_35 = arith.constant 0 : index
    %c0_36 = arith.constant 0 : index
    %c0_37 = arith.constant 0 : index
    %c0_38 = arith.constant 0 : index
    %64 = vector.load %arg3[%c0_35, %c0_36, %c0_37, %c0_38] : memref<1x8x16x4xf32, #tpu.memory_space<vmem>>, vector<1x8x16x4xf32>
    %65 = vector.shape_cast %64 : vector<1x8x16x4xf32> to vector<8x16x4xf32>
    %66 = vector.shape_cast %65 : vector<8x16x4xf32> to vector<128x4xf32>
    %67 = arith.addf %66, %63 : vector<128x4xf32>
    %68 = vector.shape_cast %67 : vector<128x4xf32> to vector<8x16x4xf32>
    %c0_39 = arith.constant 0 : index
    %c0_40 = arith.constant 0 : index
    %c0_41 = arith.constant 0 : index
    %c0_42 = arith.constant 0 : index
    %69 = vector.load %arg6[%c0_39, %c0_40, %c0_41, %c0_42] : memref<1x8x16x4xf32, #tpu.memory_space<vmem>>, vector<1x8x16x4xf32>
    %70 = vector.shape_cast %69 : vector<1x8x16x4xf32> to vector<8x16x4xf32>
    %71 = vector.shape_cast %68 : vector<8x16x4xf32> to vector<1x8x16x4xf32>
    tpu.vector_store %arg6[%c0_39, %c0_40, %c0_41, %c0_42], %71 {strides = array<i32>} : memref<1x8x16x4xf32, #tpu.memory_space<vmem>>, vector<1x8x16x4xf32>,
    return
  }
  func.func @transform_0(%arg0: i32, %arg1: i32) -> (i32, i32, i32, i32) {
    %c2_i32 = arith.constant 2 : i32
    %0 = arith.muli %arg0, %c2_i32 : i32
    %1 = arith.addi %0, %arg1 : i32
    %c0_i32 = arith.constant 0 : i32
    %c0_i32_0 = arith.constant 0 : i32
    %c0_i32_1 = arith.constant 0 : i32
    %c0_i32_2 = arith.constant 0 : i32
    return %1, %c0_i32, %c0_i32_0, %c0_i32_1 : i32, i32, i32, i32
  }
  func.func @transform_1(%arg0: i32, %arg1: i32) -> (i32, i32, i32, i32) {
    %c0_i32 = arith.constant 0 : i32
    %c0_i32_0 = arith.constant 0 : i32
    %c0_i32_1 = arith.constant 0 : i32
    return %arg0, %arg1, %c0_i32, %c0_i32_0 : i32, i32, i32, i32
  }
  func.func @transform_2(%arg0: i32, %arg1: i32) -> (i32, i32, i32) {
    %c0_i32 = arith.constant 0 : i32
    %c0_i32_0 = arith.constant 0 : i32
    %c0_i32_1 = arith.constant 0 : i32
    %c0_i32_2 = arith.constant 0 : i32
    return %c0_i32, %c0_i32_0, %c0_i32_1 : i32, i32, i32
  }
  func.func @transform_3(%arg0: i32, %arg1: i32) -> (i32, i32) {
    %c0_i32 = arith.constant 0 : i32
    %c0_i32_0 = arith.constant 0 : i32
    %c0_i32_1 = arith.constant 0 : i32
    return %c0_i32, %c0_i32_0 : i32, i32
  }
  func.func @transform_4(%arg0: i32, %arg1: i32) -> (i32, i32, i32, i32) {
    %c0_i32 = arith.constant 0 : i32
    %c0_i32_0 = arith.constant 0 : i32
    %c0_i32_1 = arith.constant 0 : i32
    return %arg0, %arg1, %c0_i32, %c0_i32_0 : i32, i32, i32, i32
  }
}

</mosaic_0001>

<bundles_post_ra>
// kernel: tpu_custom_call.1
= control target key start
LH: loop header
LB: loop body
LE: loop exit
PB: predicated region body
PF: predicated region fallthrough
CT: control target
= control target key end

     0   :  { %s3139_s15 = smov 0   ;;  %s3141_s16 = smov 0   ;;  %s4088_s0 = inlined_call_operand.vmem [shape: f32[4,10,18,4], index: 0, kind: input, shape index: {}]   ;;  %s4089_s1 = inlined_call_operand.vmem [shape: f32[2,16,16,4], index: 1, kind: input, shape index: {}]   ;;  %s4090_s2 = inlined_call_operand.vmem [shape: f32[9,4,8], index: 2, kind: input, shape index: {}]   ;;  %s4091_s3 = inlined_call_operand.vmem [shape: f32[8,4], index: 3, kind: input, shape index: {}]   ;;  %s4092_s4 = inlined_call_operand.vmem [shape: f32[2,16,16,4], index: 4, kind: output, shape index: {}]  }
   0x1   :  { %s3143_s17 = smov 0   ;;  %s3145_s18 = smov 0  }
   0x2   :  { %s3147_s19 = smov 0  }
   0x3 LB: > { %s23_s20 = sadd.s32 1, %s3104_s17  ;;  %s26_s21 = sadd.s32 1, %s3108_s18  ;;  %s3112_s19 = sphi %s3147_s19, %s14_s19   ;;  %s3108_s18 = sphi %s3145_s18, %s4152_s18   ;;  %s3104_s17 = sphi %s3143_s17, %s4151_s17   ;;  %s3100_s16 = sphi %s3141_s16, %s4150_s16   ;;  %s3096_s15 = sphi %s3139_s15, %s4149_s15  }
   0x4   : > { %p24_p0 = scmp.ge.s32.totalorder %s23_s20, 2  ;;  %p2413_p1 = scmp.ge.s32.totalorder %s3112_s19, 1 }
   0x5   : > { %p202_p2 = scmp.lt.s32.totalorder %s3112_s19, 5 }
   0x6   : > { %s4154_s20 = smov (%p24_p0, %s23_s20), 0  ;;  %s4156_s21 = smov (!%p24_p0, %s26_s21), %s3108_s18 }
   0x7   : > { %p203_p3 = pnand %p2413_p1, %p202_p2  ;;  %p28_p4 = scmp.ge.s32.totalorder %s4156_s21, 2 }
   0x9   : > { %s4158_s21 = smov (%p28_p4, %s4156_s21), 0  ;;  %206 = sbr.rel (%p203_p3) target bundleno = 583 (0x247), region = 36 }
   0xe   : > { %v2424_v0 = vld [vmem:[%s4090_s2 + $0x4] sm:$0xf]  ;;  %vm407_vm0 = vcmask 1043456   ;;  %v306_v1 = vld [vmem:[%s4090_s2] sm:$0xf]  ;;  %s2414_s26 = sshll.u32 %s3100_s16, 1 }
   0xf   : > { %2773 = vmatprep.subr.msk.mxu0 %vm407_vm0, %v2424_v0  ;;  %2799 = vmatprep.subr.msk.mxu1 %vm407_vm0, %v306_v1  ;;  %s246_s27 = sadd.s32 %s3096_s15, %s2414_s26  ;;  %v2459_v2 = vld [vmem:[%s4090_s2 + $0x8] sm:$0xf]  ;;  %v2477_v3 = vld [vmem:[%s4090_s2 + $0xc] sm:$0xf]  ;;  %vm374_vm1 = vcmask 31744   ;;  %vm331_vm2 = vcmask 1046528  }
  0x10   : > { %2774 = vmatpush3.msk.msra.mxu0 %vm407_vm0, %v2424_v0  ;;  %p247_p5 = scmp.lt.s32.totalorder %s246_s27, 3  ;;  %2800 = vmatpush3.msk.msra.mxu1 %vm407_vm0, %v306_v1  ;;  %v3201_v4 = vld [vmem:[%s4090_s2 + $0x14] sm:$0xf]  ;;  %v3260_v27 = vld [vmem:[%s4090_s2 + $0x10] sm:$0xf]  ;;  %vm736_vm3 = vcmask 1045504  }
  0x11   : > { %2825 = vmatprep.subr.msk.mxu0 %vm407_vm0, %v2459_v2  ;;  %2851 = vmatprep.subr.msk.mxu1 %vm407_vm0, %v2477_v3  ;;  %vm2038_vm4 = vcmask 64512   ;;  %s2416_s29 = sshll.u32 %s3096_s15, 3  ;;  %p255_p6 = scmp.lt.s32.totalorder %s3100_s16, 1 }
  0x12   : > { %s4160_s27 = smov (!%p247_p5, %s246_s27), 3  ;;  %p257_p7 = scmp.lt.s32.totalorder %s2416_s29, 15 }
  0x13   : > { %s3033_s6 = smul.u32 240, %s4160_s27  ;;  %s4162_s16 = smov (!%p255_p6, %s3100_s16), 1 }
  0x14   : > { %s4164_s29 = smov (!%p257_p7, %s2416_s29), 15  ;;  %s2418_s5 = sshll.u32 %s4162_s16, 5 }
  0x15   : > { %s3196_s9 = scalar_lea.vmem %s4088_s0, %s3033_s6  ;;  %s2417_s30 = sshll.u32 %s4164_s29, 1 }
  0x16   : > { %v3204_v5 = vld [vmem:[%s3196_s9] sm:$0xff]  ;;  %v3207_v6 = vld [vmem:[%s3196_s9 + $0x8] sm:$0xff]  ;;  %v3210_v7 = vld [vmem:[%s3196_s9 + $0x10] sm:$0x3]  ;;  %s261_s6 = sadd.s32 %s2418_s5, %s2417_s30 }
  0x17   : > { %v332_v8 = vrot.slane %v3204_v5, 1  ;;  %v333_v9 = vrot.slane %v3207_v6, 1  ;;  %2801 = vmatprep.mubr.msk.f32.mxu1 %vm374_vm1, %v3204_v5  ;;  %v335_v10 = vrot.slane %v3210_v7, 1  ;;  %v3218_v11 = vld [vmem:[%s3196_s9 + $0x18] sm:$0xff]  ;;  %v3221_v12 = vld [vmem:[%s3196_s9 + $0x20] sm:$0xff]  ;;  %v3231_v16 = vld [vmem:[%s3196_s9 + $0x30] sm:$0xff] }
  0x18   : > { %2802 = vmatmul.mubr.msk.f32.vlgmr.msra.gmra.mxu1 %vm374_vm1, %v3207_v6  ;;  %v337_v13 = vrot.slane %v3218_v11, 1  ;;  %v338_v14 = vrot.slane %v3221_v12, 1  ;;  %v3228_v15 = vld [vmem:[%s3196_s9 + $0x28] sm:$0x3]  ;;  %v3234_v17 = vld [vmem:[%s3196_s9 + $0x38] sm:$0xff]  ;;  %v342_v21 = vrot.slane %v3231_v16, 1 }
  0x19   : > { %v334_v18 = vsel %vm331_vm2, %v332_v8, %v333_v9  ;;  %v336_v19 = vsel %vm331_vm2, %v333_v9, %v335_v10  ;;  %2804 = vmatprep.mubr.msk.f32.mxu1 %vm374_vm1, %v3218_v11  ;;  %v340_v20 = vrot.slane %v3228_v15, 1  ;;  %v3243_v22 = vld [vmem:[%s3196_s9 + $0x40] sm:$0x3]  ;;  %2852 = vmatpush3.msk.msra.mxu1 %vm407_vm0, %v2477_v3  ;;  %v343_v24 = vrot.slane %v3234_v17, 1  ;;  %v3252_v25 = vld [vmem:[%s3196_s9 + $0x48] sm:$0xff]  ;;  %v3255_v26 = vld [vmem:[%s3196_s9 + $0x50] sm:$0xff] }
  0x1a   : > { %2775 = vmatprep.mubr.msk.f32.mxu0 %vm374_vm1, %v334_v18  ;;  %v3248_v23 = vsel %vm331_vm2, %v337_v13, %v338_v14  ;;  %2903 = vmatprep.subr.msk.mxu1 %vm407_vm0, %v3201_v4  ;;  %v345_v29 = vrot.slane %v3243_v22, 1  ;;  %v347_v31 = vrot.slane %v3252_v25, 1  ;;  %v348_v32 = vrot.slane %v3255_v26, 1  ;;  %v3280_v33 = vld [vmem:[%s3196_s9 + $0x58] sm:$0x3]  ;;  %v3287_v34 = vld [vmem:[%s3196_s9 + $0x60] sm:$0xff] }
  0x1b   : > { %2776 = vmatmul.mubr.msk.f32.vlgmr.msra.gmra.mxu0 %vm374_vm1, %v336_v19  ;;  %v3269_v28 = vsel %vm331_vm2, %v338_v14, %v340_v20  ;;  %v3275_v30 = vsel %vm331_vm2, %v342_v21, %v343_v24  ;;  %v3290_v35 = vld [vmem:[%s3196_s9 + $0x68] sm:$0xff]  ;;  %v350_v37 = vrot.slane %v3280_v33, 1  ;;  %v352_v39 = vrot.slane %v3287_v34, 1  ;;  %v3308_v41 = vld [vmem:[%s3196_s9 + $0x70] sm:$0x3]  ;;  %v3313_v42 = vld [vmem:[%s3196_s9 + $0x78] sm:$0xff] }
  0x1c   : > { %2826 = vmatpush3.msk.msra.mxu0 %vm407_vm0, %v2459_v2  ;;  %2778 = vmatprep.mubr.msk.f32.mxu0 %vm374_vm1, %v3248_v23  ;;  %v3297_v36 = vsel %vm331_vm2, %v343_v24, %v345_v29  ;;  %v3303_v38 = vsel %vm331_vm2, %v347_v31, %v348_v32  ;;  %v353_v40 = vrot.slane %v3290_v35, 1  ;;  %v3316_v43 = vld [vmem:[%s3196_s9 + $0x80] sm:$0xff]  ;;  %v355_v45 = vrot.slane %v3308_v41, 1  ;;  %v3334_v49 = vld [vmem:[%s3196_s9 + $0x88] sm:$0x3]  ;;  %v3339_v50 = vld [vmem:[%s3196_s9 + $0x90] sm:$0xff] }
  0x1d   : > { %2805 = vmatmul.mubr.msk.f32.gmra.mxu1 %vm374_vm1, %v3221_v12  ;;  %2877 = vmatprep.subr.msk.mxu0 %vm407_vm0, %v3260_v27  ;;  %v3323_v44 = vsel %vm331_vm2, %v348_v32, %v350_v37  ;;  %v357_v47 = vrot.slane %v3313_v42, 1  ;;  %v358_v48 = vrot.slane %v3316_v43, 1  ;;  %v3342_v51 = vld [vmem:[%s3196_s9 + $0x98] sm:$0xff]  ;;  %v360_v53 = vrot.slane %v3334_v49, 1  ;;  %v3353_v54 = vld [vmem:[%s3196_s9 + $0xa0] sm:$0x3] }
  0x1e   : > { %2807 = vmatprep.mubr.msk.f32.mxu1 %vm374_vm1, %v3231_v16  ;;  %v3329_v46 = vsel %vm331_vm2, %v352_v39, %v353_v40  ;;  %v3349_v52 = vsel %vm331_vm2, %v353_v40, %v355_v45  ;;  %v362_v56 = vrot.slane %v3339_v50, 1  ;;  %v363_v57 = vrot.slane %v3342_v51, 1  ;;  %v3363_v58 = vld [vmem:[%s3196_s9 + $0xa8] sm:$0xff]  ;;  %v3366_v59 = vld [vmem:[%s3196_s9 + $0xd0] sm:$0x3]  ;;  %v3377_v62 = vld [vmem:[%s3196_s9 + $0xd8] sm:$0xff] }
  0x1f   : > { %2779 = vmatmul.mubr.msk.f32.gmra.mxu0 %vm374_vm1, %v3269_v28  ;;  %v3358_v55 = vsel %vm331_vm2, %v357_v47, %v358_v48  ;;  %v3371_v60 = vld [vmem:[%s3196_s9 + $0xb0] sm:$0xff]  ;;  %v3374_v61 = vld [vmem:[%s3196_s9 + $0xc8] sm:$0xff]  ;;  %v3383_v0 = vld [vmem:[%s3196_s9 + $0xe0] sm:$0xff]  ;;  %v3388_v1 = vsel %vm331_vm2, %v358_v48, %v360_v53  ;;  %v365_v2 = vrot.slane %v3353_v54, 1  ;;  %v1151_v3 = vrot.slane %v3366_v59, 1  ;;  %s2419_s7 = sshll.u32 %s261_s6, 3 }
  0x20   : > { %2781 = vmatprep.mubr.msk.f32.mxu0 %vm374_vm1, %v3275_v30  ;;  %v1149_v63 = vrot.slane %v3374_v61, 1  ;;  %v305_v8 = vld [vmem:[%s3196_s9 + $0xe8] sm:$0x3]  ;;  %v3396_v9 = vsel %vm331_vm2, %v362_v56, %v363_v57  ;;  %v367_v10 = vrot.slane %v3363_v58, 1  ;;  %v368_v13 = vrot.slane %v3371_v60, 1  ;;  %s4018_s10 = scalar_lea.vmem %s4089_s1, %s2419_s7  ;;  %s4024_s12 = scalar_lea.vmem %s4092_s4, %s2419_s7 }
  0x21   : > { %2808 = vmatmul.mubr.msk.f32.gmra.mxu1 %vm374_vm1, %v3234_v17  ;;  %v3401_v14 = vld [vmem:[%s3196_s9 + $0xb8] sm:$0x3]  ;;  %v1671_v18 = vrot.slane %v3377_v62, 1  ;;  %v1672_v20 = vrot.slane %v3383_v0, 1  ;;  %v1846_v21 = vrot.slane %v3377_v62, 2  ;;  %v1847_v24 = vrot.slane %v3383_v0, 2 }
  0x22   : > { %2810 = vmatprep.mubr.msk.f32.mxu1 %vm374_vm1, %v3252_v25  ;;  %v3409_v19 = vsel %vm331_vm2, %v1149_v63, %v1151_v3  ;;  %v1674_v29 = vrot.slane %v305_v8, 1  ;;  %v3419_v31 = vsel %vm331_vm2, %v363_v57, %v365_v2  ;;  %v370_v32 = vrot.slane %v3401_v14, 1 }
  0x23   : > { %2782 = vmatmul.mubr.msk.f32.gmra.mxu0 %vm374_vm1, %v3297_v36  ;;  %v3423_v37 = vsel %vm331_vm2, %v1671_v18, %v1672_v20  ;;  %v3428_v39 = vsel %vm331_vm2, %v367_v10, %v368_v13  ;;  %v737_v40 = vrot.slane %v3204_v5, 2  ;;  %v738_v45 = vrot.slane %v3207_v6, 2  ;;  %v3466_v10 = vld [vmem:[%s4090_s2 + $0x1c] sm:$0xf] }
  0x24   : > { %2784 = vmatprep.mubr.msk.f32.mxu0 %vm374_vm1, %v3303_v38  ;;  %v3433_v47 = vsel %vm331_vm2, %v1672_v20, %v1674_v29  ;;  %v3440_v48 = vsel %vm736_vm3, %v1846_v21, %v1847_v24  ;;  %v740_v53 = vrot.slane %v3210_v7, 2  ;;  %v3446_v5 = vsel %vm331_vm2, %v368_v13, %v370_v32 }
  0x25   : > { %2811 = vmatmul.mubr.msk.f32.gmra.mxu1 %vm374_vm1, %v3255_v26  ;;  %v1849_v6 = vrot.slane %v305_v8, 2  ;;  %v739_v56 = vsel %vm736_vm3, %v737_v40, %v738_v45  ;;  %v742_v57 = vrot.slane %v3218_v11, 2  ;;  %v743_v2 = vrot.slane %v3221_v12, 2 }
  0x26   : > { %2813 = vmatprep.mubr.msk.f32.mxu1 %vm374_vm1, %v3287_v34  ;;  %v741_v3 = vsel %vm736_vm3, %v738_v45, %v740_v53  ;;  %v745_v8 = vrot.slane %v3228_v15, 2  ;;  %v747_v13 = vrot.slane %v3231_v16, 2  ;;  %v748_v18 = vrot.slane %v3234_v17, 2  ;;  %v3482_v15 = vld [vmem:[%s4090_s2 + $0x18] sm:$0xf] }
  0x27   : > { %2785 = vmatmul.mubr.msk.f32.gmra.mxu0 %vm374_vm1, %v3323_v44  ;;  %v3456_v7 = vsel %vm736_vm3, %v1847_v24, %v1849_v6  ;;  %v752_v21 = vrot.slane %v3252_v25, 2  ;;  %v753_v24 = vrot.slane %v3255_v26, 2  ;;  %v757_v32 = vrot.slane %v3287_v34, 2 }
  0x28   : > { %2787 = vmatprep.mubr.msk.f32.mxu0 %vm374_vm1, %v3329_v46  ;;  %v3496_v20 = vsel %vm736_vm3, %v747_v13, %v748_v18  ;;  %v758_v40 = vrot.slane %v3290_v35, 2  ;;  %v760_v45 = vrot.slane %v3308_v41, 2  ;;  %v762_v6 = vrot.slane %v3313_v42, 2 }
  0x29   : > { %2814 = vmatmul.mubr.msk.f32.gmra.mxu1 %vm374_vm1, %v3290_v35  ;;  %v3514_v29 = vsel %vm736_vm3, %v752_v21, %v753_v24  ;;  %v770_v13 = vrot.slane %v3353_v54, 2  ;;  %v773_v21 = vrot.slane %v3371_v60, 2 }
  0x2a   : > { %2816 = vmatprep.mubr.msk.f32.mxu1 %vm374_vm1, %v3313_v42  ;;  %v3531_v53 = vsel %vm736_vm3, %v757_v32, %v758_v40  ;;  %v3542_v41 = vsel %vm736_vm3, %v758_v40, %v760_v45 }
  0x2b   : > { %2788 = vmatmul.mubr.msk.f32.gmra.mxu0 %vm374_vm1, %v3349_v52 }
  0x2c   : > { %2790 = vmatprep.mubr.msk.f32.mxu0 %vm374_vm1, %v3358_v55 }
  0x2d   : > { %2817 = vmatmul.mubr.msk.f32.gmra.mxu1 %vm374_vm1, %v3316_v43 }
  0x2e   : > { %2819 = vmatprep.mubr.msk.f32.mxu1 %vm374_vm1, %v3339_v50 }
  0x2f   : > { %2791 = vmatmul.mubr.msk.f32.gmra.mxu0 %vm374_vm1, %v3388_v1 }
  0x30   : > { %2793 = vmatprep.mubr.msk.f32.mxu0 %vm374_vm1, %v3396_v9 }
  0x31   : > { %2820 = vmatmul.mubr.msk.f32.gmra.mxu1 %vm374_vm1, %v3342_v51 }
  0x32   : > { %2822 = vmatprep.mubr.msk.f32.mxu1 %vm374_vm1, %v3363_v58 }
  0x33   : > { %2794 = vmatmul.mubr.msk.f32.gmra.mxu0 %vm374_vm1, %v3419_v31 }
  0x34   : > { %2796 = vmatprep.mubr.msk.f32.mxu0 %vm374_vm1, %v3428_v39 }
  0x35   : > { %2823 = vmatmul.mubr.msk.f32.gmra.mxu1 %vm374_vm1, %v3371_v60 }
  0x36   : > { %2853 = vmatprep.mubr.msk.f32.mxu1 %vm374_vm1, %v3218_v11  ;;  %v3471_v11 = vsel %vm736_vm3, %v742_v57, %v743_v2  ;;  %v765_v57 = vrot.slane %v3334_v49, 2 }
  0x37   : > { %2797 = vmatmul.mubr.msk.f32.gmra.mxu0 %vm374_vm1, %v3446_v5 }
  0x38   : > { %2827 = vmatprep.mubr.msk.f32.mxu0 %vm374_vm1, %v739_v56  ;;  %v763_v56 = vrot.slane %v3316_v43, 2 }
  0x39   : > { %2854 = vmatmul.mubr.msk.f32.vlgmr.msra.gmra.mxu1 %vm374_vm1, %v3221_v12  ;;  %v746_v12 = vsel %vm736_vm3, %v743_v2, %v745_v8  ;;  %v768_v8 = vrot.slane %v3342_v51, 2 }
  0x3a   : > { %2856 = vmatprep.mubr.msk.f32.mxu1 %vm374_vm1, %v3231_v16  ;;  %2904 = vmatpush3.msk.msra.mxu1 %vm407_vm0, %v3201_v4  ;;  %v750_v4 = vrot.slane %v3243_v22, 2  ;;  %v3548_v2 = vsel %vm736_vm3, %v762_v6, %v763_v56  ;;  %v3559_v49 = vsel %vm736_vm3, %v763_v56, %v765_v57 }
  0x3b   : > { %2828 = vmatmul.mubr.msk.f32.vlgmr.msra.gmra.mxu0 %vm374_vm1, %v741_v3  ;;  %2955 = vmatprep.subr.msk.mxu1 %vm407_vm0, %v3466_v10  ;;  %v767_v3 = vrot.slane %v3339_v50, 2  ;;  %v3579_v54 = vsel %vm736_vm3, %v768_v8, %v770_v13 }
  0x3c   : > { %2878 = vmatpush3.msk.msra.mxu0 %vm407_vm0, %v3260_v27  ;;  %2830 = vmatprep.mubr.msk.f32.mxu0 %vm374_vm1, %v3471_v11  ;;  %v3508_v22 = vsel %vm736_vm3, %v748_v18, %v750_v4  ;;  %v755_v27 = vrot.slane %v3280_v33, 2  ;;  %v772_v4 = vrot.slane %v3363_v58, 2 }
  0x3d   : > { %2857 = vmatmul.mubr.msk.f32.gmra.mxu1 %vm374_vm1, %v3234_v17  ;;  %2929 = vmatprep.subr.msk.mxu0 %vm407_vm0, %v3482_v15  ;;  %v3565_v18 = vsel %vm736_vm3, %v767_v3, %v768_v8 }
  0x3e   : > { %2859 = vmatprep.mubr.msk.f32.mxu1 %vm374_vm1, %v3252_v25  ;;  %v3525_v33 = vsel %vm736_vm3, %v753_v24, %v755_v27  ;;  %v3574_v24 = vld [vmem:[%s3196_s9 + $0xc0] sm:$0xff]  ;;  %v775_v27 = vrot.slane %v3401_v14, 2  ;;  %v3585_v32 = vsel %vm736_vm3, %v772_v4, %v773_v21 }
  0x3f   : > { %2831 = vmatmul.mubr.msk.f32.gmra.mxu0 %vm374_vm1, %v746_v12  ;;  %v2567_v14 = vld [vmem:[%s4090_s2 + $0x20] sm:$0xf] }
  0x40   : > { %2833 = vmatprep.mubr.msk.f32.mxu0 %vm374_vm1, %v3496_v20  ;;  %v3594_v40 = vsel %vm736_vm3, %v773_v21, %v775_v27 }
  0x41   : > { %2860 = vmatmul.mubr.msk.f32.gmra.mxu1 %vm374_vm1, %v3255_v26 }
  0x42   : > { %2862 = vmatprep.mubr.msk.f32.mxu1 %vm374_vm1, %v3287_v34 }
  0x43   : > { %2834 = vmatmul.mubr.msk.f32.gmra.mxu0 %vm374_vm1, %v3508_v22 }
  0x44   : > { %2836 = vmatprep.mubr.msk.f32.mxu0 %vm374_vm1, %v3514_v29 }
  0x45   : > { %2863 = vmatmul.mubr.msk.f32.gmra.mxu1 %vm374_vm1, %v3290_v35 }
  0x46   : > { %2865 = vmatprep.mubr.msk.f32.mxu1 %vm374_vm1, %v3313_v42 }
  0x47   : > { %2837 = vmatmul.mubr.msk.f32.gmra.mxu0 %vm374_vm1, %v3525_v33 }
  0x48   : > { %2839 = vmatprep.mubr.msk.f32.mxu0 %vm374_vm1, %v3531_v53 }
  0x49   : > { %2866 = vmatmul.mubr.msk.f32.gmra.mxu1 %vm374_vm1, %v3316_v43 }
  0x4a   : > { %2868 = vmatprep.mubr.msk.f32.mxu1 %vm374_vm1, %v3339_v50 }
  0x4b   : > { %2840 = vmatmul.mubr.msk.f32.gmra.mxu0 %vm374_vm1, %v3542_v41 }
  0x4c   : > { %2842 = vmatprep.mubr.msk.f32.mxu0 %vm374_vm1, %v3548_v2 }
  0x4d   : > { %2869 = vmatmul.mubr.msk.f32.gmra.mxu1 %vm374_vm1, %v3342_v51 }
  0x4e   : > { %2871 = vmatprep.mubr.msk.f32.mxu1 %vm374_vm1, %v3363_v58 }
  0x4f   : > { %2843 = vmatmul.mubr.msk.f32.gmra.mxu0 %vm374_vm1, %v3559_v49 }
  0x50   : > { %2845 = vmatprep.mubr.msk.f32.mxu0 %vm374_vm1, %v3565_v18 }
  0x51   : > { %2872 = vmatmul.mubr.msk.f32.gmra.mxu1 %vm374_vm1, %v3371_v60 }
  0x52   : > { %2874 = vmatprep.mubr.msk.f32.mxu1 %vm374_vm1, %v3574_v24 }
  0x53   : > { %2846 = vmatmul.mubr.msk.f32.gmra.mxu0 %vm374_vm1, %v3579_v54 }
  0x54   : > { %2848 = vmatprep.mubr.msk.f32.mxu0 %vm374_vm1, %v3585_v32 }
  0x55   : > { %2875 = vmatmul.mubr.msk.f32.gmra.mxu1 %vm374_vm1, %v3374_v61 }
  0x56   : > { %2905 = vmatprep.mubr.msk.f32.mxu1 %vm374_vm1, %v3471_v11  ;;  %v1326_v11 = vrot.slane %v3366_v59, 2 }
  0x57   : > { %2849 = vmatmul.mubr.msk.f32.gmra.mxu0 %vm374_vm1, %v3594_v40 }
  0x58   : > { %2879 = vmatprep.mubr.msk.f32.mxu0 %vm374_vm1, %v3248_v23  ;;  %v1323_v23 = vrot.slane %v3574_v24, 2 }
  0x59   : > { %2906 = vmatmul.mubr.msk.f32.vlgmr.msra.gmra.mxu1 %vm374_vm1, %v746_v12 }
  0x5a   : > { %2908 = vmatprep.mubr.msk.f32.mxu1 %vm374_vm1, %v3496_v20  ;;  %2956 = vmatpush3.msk.msra.mxu1 %vm407_vm0, %v3466_v10  ;;  %v1148_v10 = vrot.slane %v3574_v24, 1 }
  0x5b   : > { %2880 = vmatmul.mubr.msk.f32.vlgmr.msra.gmra.mxu0 %vm374_vm1, %v3269_v28  ;;  %v1324_v28 = vrot.slane %v3374_v61, 2 }
  0x5c   : > { %2930 = vmatpush3.msk.msra.mxu0 %vm407_vm0, %v3482_v15  ;;  %2882 = vmatprep.mubr.msk.f32.mxu0 %vm374_vm1, %v3275_v30  ;;  %v1150_v12 = vsel %vm331_vm2, %v1148_v10, %v1149_v63 }
  0x5d   : > { %2909 = vmatmul.mubr.msk.f32.gmra.mxu1 %vm374_vm1, %v3508_v22  ;;  %2981 = vmatprep.subr.msk.mxu0 %vm407_vm0, %v2567_v14  ;;  %v1325_v15 = vsel %vm736_vm3, %v1323_v23, %v1324_v28  ;;  %v1327_v45 = vsel %vm736_vm3, %v1324_v28, %v1326_v11 }
  0x5e   : > { %2911 = vmatprep.mubr.msk.f32.mxu1 %vm374_vm1, %v3514_v29 }
  0x5f   : > { %2883 = vmatmul.mubr.msk.f32.gmra.mxu0 %vm374_vm1, %v3297_v36 }
  0x60   : > { %2885 = vmatprep.mubr.msk.f32.mxu0 %vm374_vm1, %v3303_v38 }
  0x61   : > { %2912 = vmatmul.mubr.msk.f32.gmra.mxu1 %vm374_vm1, %v3525_v33 }
  0x62   : > { %2914 = vmatprep.mubr.msk.f32.mxu1 %vm374_vm1, %v3531_v53 }
  0x63   : > { %2886 = vmatmul.mubr.msk.f32.gmra.mxu0 %vm374_vm1, %v3323_v44 }
  0x64   : > { %2888 = vmatprep.mubr.msk.f32.mxu0 %vm374_vm1, %v3329_v46 }
  0x65   : > { %2915 = vmatmul.mubr.msk.f32.gmra.mxu1 %vm374_vm1, %v3542_v41 }
  0x66   : > { %2917 = vmatprep.mubr.msk.f32.mxu1 %vm374_vm1, %v3548_v2 }
  0x67   : > { %2889 = vmatmul.mubr.msk.f32.gmra.mxu0 %vm374_vm1, %v3349_v52 }
  0x68   : > { %2891 = vmatprep.mubr.msk.f32.mxu0 %vm374_vm1, %v3358_v55 }
  0x69   : > { %2918 = vmatmul.mubr.msk.f32.gmra.mxu1 %vm374_vm1, %v3559_v49 }
  0x6a   : > { %2920 = vmatprep.mubr.msk.f32.mxu1 %vm374_vm1, %v3565_v18 }
  0x6b   : > { %2892 = vmatmul.mubr.msk.f32.gmra.mxu0 %vm374_vm1, %v3388_v1 }
  0x6c   : > { %2894 = vmatprep.mubr.msk.f32.mxu0 %vm374_vm1, %v3396_v9 }
  0x6d   : > { %2921 = vmatmul.mubr.msk.f32.gmra.mxu1 %vm374_vm1, %v3579_v54 }
  0x6e   : > { %2923 = vmatprep.mubr.msk.f32.mxu1 %vm374_vm1, %v3585_v32 }
  0x6f   : > { %2895 = vmatmul.mubr.msk.f32.gmra.mxu0 %vm374_vm1, %v3419_v31 }
  0x70   : > { %2897 = vmatprep.mubr.msk.f32.mxu0 %vm374_vm1, %v3428_v39 }
  0x71   : > { %2924 = vmatmul.mubr.msk.f32.gmra.mxu1 %vm374_vm1, %v3594_v40 }
  0x72   : > { %2926 = vmatprep.mubr.msk.f32.mxu1 %vm374_vm1, %v1325_v15 }
  0x73   : > { %2898 = vmatmul.mubr.msk.f32.gmra.mxu0 %vm374_vm1, %v3446_v5 }
  0x74   : > { %2900 = vmatprep.mubr.msk.f32.mxu0 %vm374_vm1, %v1150_v12 }
  0x75   : > { %2927 = vmatmul.mubr.msk.f32.gmra.mxu1 %vm374_vm1, %v1327_v45 }
  0x76   : > { %2957 = vmatprep.mubr.msk.f32.mxu1 %vm374_vm1, %v3275_v30 }
  0x77   : > { %2901 = vmatmul.mubr.msk.f32.gmra.mxu0 %vm374_vm1, %v3409_v19 }
  0x78   : > { %2931 = vmatprep.mubr.msk.f32.mxu0 %vm374_vm1, %v3231_v16  ;;  %v2037_v16 = vld [vmem:[%s4091_s3] sm:$0xff] }
  0x79   : > { %2958 = vmatmul.mubr.msk.f32.vlgmr.msra.gmra.mxu1 %vm374_vm1, %v3297_v36  ;;  %3007 = vmatprep.subr.mxu1 %v2037_v16 }
  0x7a   : > { %2960 = vmatprep.mubr.msk.f32.mxu1 %vm374_vm1, %v3303_v38  ;;  %3008 = vmatpush3.msra.mxu1 %v2037_v16 }
  0x7b   : > { %2932 = vmatmul.mubr.msk.f32.vlgmr.msra.gmra.mxu0 %vm374_vm1, %v3234_v17 }
  0x7c   : > { %2982 = vmatpush3.msk.msra.mxu0 %vm407_vm0, %v2567_v14  ;;  %2934 = vmatprep.mubr.msk.f32.mxu0 %vm374_vm1, %v3252_v25 }
  0x7d   : > { %2961 = vmatmul.mubr.msk.f32.gmra.mxu1 %vm374_vm1, %v3323_v44 }
  0x7e   : > { %2963 = vmatprep.mubr.msk.f32.mxu1 %vm374_vm1, %v3329_v46 }
  0x7f   : > { %2935 = vmatmul.mubr.msk.f32.gmra.mxu0 %vm374_vm1, %v3255_v26 }
  0x80   : > { %2937 = vmatprep.mubr.msk.f32.mxu0 %vm374_vm1, %v3287_v34 }
  0x81   : > { %2964 = vmatmul.mubr.msk.f32.gmra.mxu1 %vm374_vm1, %v3349_v52 }
  0x82   : > { %2966 = vmatprep.mubr.msk.f32.mxu1 %vm374_vm1, %v3358_v55 }
  0x83   : > { %2938 = vmatmul.mubr.msk.f32.gmra.mxu0 %vm374_vm1, %v3290_v35 }
  0x84   : > { %2940 = vmatprep.mubr.msk.f32.mxu0 %vm374_vm1, %v3313_v42 }
  0x85   : > { %2967 = vmatmul.mubr.msk.f32.gmra.mxu1 %vm374_vm1, %v3388_v1 }
  0x86   : > { %2969 = vmatprep.mubr.msk.f32.mxu1 %vm374_vm1, %v3396_v9 }
  0x87   : > { %2941 = vmatmul.mubr.msk.f32.gmra.mxu0 %vm374_vm1, %v3316_v43 }
  0x88   : > { %2943 = vmatprep.mubr.msk.f32.mxu0 %vm374_vm1, %v3339_v50 }
  0x89   : > { %2970 = vmatmul.mubr.msk.f32.gmra.mxu1 %vm374_vm1, %v3419_v31 }
  0x8a   : > { %2972 = vmatprep.mubr.msk.f32.mxu1 %vm374_vm1, %v3428_v39 }
  0x8b   : > { %2944 = vmatmul.mubr.msk.f32.gmra.mxu0 %vm374_vm1, %v3342_v51 }
  0x8c   : > { %2946 = vmatprep.mubr.msk.f32.mxu0 %vm374_vm1, %v3363_v58 }
  0x8d   : > { %2973 = vmatmul.mubr.msk.f32.gmra.mxu1 %vm374_vm1, %v3446_v5 }
  0x8e   : > { %2975 = vmatprep.mubr.msk.f32.mxu1 %vm374_vm1, %v1150_v12 }
  0x8f   : > { %2947 = vmatmul.mubr.msk.f32.gmra.mxu0 %vm374_vm1, %v3371_v60 }
  0x90   : > { %2949 = vmatprep.mubr.msk.f32.mxu0 %vm374_vm1, %v3574_v24 }
  0x91   : > { %2976 = vmatmul.mubr.msk.f32.gmra.mxu1 %vm374_vm1, %v3409_v19 }
  0x92   : > { %2978 = vmatprep.mubr.msk.f32.mxu1 %vm374_vm1, %v3423_v37 }
  0x93   : > { %2950 = vmatmul.mubr.msk.f32.gmra.mxu0 %vm374_vm1, %v3374_v61 }
  0x94   : > { %2952 = vmatprep.mubr.msk.f32.mxu0 %vm374_vm1, %v3377_v62 }
  0x95   : > { %2979 = vmatmul.mubr.msk.f32.gmra.mxu1 %vm374_vm1, %v3433_v47 }
  0x97   : > { %2953 = vmatmul.mubr.msk.f32.gmra.mxu0 %vm374_vm1, %v3383_v0 }
  0x98   : > { %2983 = vmatprep.mubr.msk.f32.mxu0 %vm374_vm1, %v3496_v20 }
  0x9b   : > { %2984 = vmatmul.mubr.msk.f32.vlgmr.msra.gmra.mxu0 %vm374_vm1, %v3508_v22 }
  0x9c   : > { %2986 = vmatprep.mubr.msk.f32.mxu0 %vm374_vm1, %v3514_v29 }
  0x9f   : > { %2987 = vmatmul.mubr.msk.f32.gmra.mxu0 %vm374_vm1, %v3525_v33 }
  0xa0   : > { %2989 = vmatprep.mubr.msk.f32.mxu0 %vm374_vm1, %v3531_v53 }
  0xa3   : > { %2990 = vmatmul.mubr.msk.f32.gmra.mxu0 %vm374_vm1, %v3542_v41 }
  0xa4   : > { %2992 = vmatprep.mubr.msk.f32.mxu0 %vm374_vm1, %v3548_v2 }
  0xa7   : > { %2993 = vmatmul.mubr.msk.f32.gmra.mxu0 %vm374_vm1, %v3559_v49 }
  0xa8   : > { %2995 = vmatprep.mubr.msk.f32.mxu0 %vm374_vm1, %v3565_v18 }
  0xab   : > { %2996 = vmatmul.mubr.msk.f32.gmra.mxu0 %vm374_vm1, %v3579_v54 }
  0xac   : > { %2998 = vmatprep.mubr.msk.f32.mxu0 %vm374_vm1, %v3585_v32 }
  0xaf   : > { %2999 = vmatmul.mubr.msk.f32.gmra.mxu0 %vm374_vm1, %v3594_v40 }
  0xb0   : > { %3001 = vmatprep.mubr.msk.f32.mxu0 %vm374_vm1, %v1325_v15 }
  0xb3   : > { %3002 = vmatmul.mubr.msk.f32.gmra.mxu0 %vm374_vm1, %v1327_v45 }
  0xb4   : > { %3004 = vmatprep.mubr.msk.f32.mxu0 %vm374_vm1, %v3440_v48 }
  0xb7   : > { %3005 = vmatmul.mubr.msk.f32.gmra.mxu0 %vm374_vm1, %v3456_v7 }
  0xd8   : > { %v2803_v17 = vpop.f32.mrf.mxu1 }
  0xda   : > { %v657_v25 = vpop.f32.mrf.mxu1 }
  0xdb   : > { %v2777_v26 = vpop.f32.mrf.mxu0 }
  0xdc   : > { %v663_v30 = vadd.f32 %v2803_v17, %v2777_v26 }
  0xdd   : > { %v477_v34 = vpop.f32.mrf.mxu0  ;;  %v2806_v35 = vpop.f32.mrf.mxu1 }
  0xde   : > { %v658_v36 = vadd.f32 %v657_v25, %v477_v34 }
  0xdf   : > { %v2780_v38 = vpop.f32.mrf.mxu0  ;;  %v667_v42 = vpop.f32.mrf.mxu1 }
  0xe0   : > { %v673_v43 = vadd.f32 %v2806_v35, %v2780_v38 }
  0xe1   : > { %v487_v44 = vpop.f32.mrf.mxu0  ;;  %v2809_v46 = vpop.f32.mrf.mxu1 }
  0xe2   : > { %v668_v50 = vadd.f32 %v667_v42, %v487_v44 }
  0xe3   : > { %v2783_v51 = vpop.f32.mrf.mxu0  ;;  %v677_v52 = vpop.f32.mrf.mxu1 }
  0xe4   : > { %v683_v55 = vadd.f32 %v2809_v46, %v2783_v51 }
  0xe5   : > { %v497_v58 = vpop.f32.mrf.mxu0  ;;  %v2812_v59 = vpop.f32.mrf.mxu1 }
  0xe6   : > { %v678_v60 = vadd.f32 %v677_v52, %v497_v58 }
  0xe7   : > { %v2786_v61 = vpop.f32.mrf.mxu0  ;;  %v687_v62 = vpop.f32.mrf.mxu1 }
  0xe8   : > { %v693_v63 = vadd.f32 %v2812_v59, %v2786_v61 }
  0xe9   : > { %v507_v0 = vpop.f32.mrf.mxu0  ;;  %v2815_v1 = vpop.f32.mrf.mxu1 }
  0xea   : > { %v688_v9 = vadd.f32 %v687_v62, %v507_v0 }
  0xeb   : > { %v2789_v19 = vpop.f32.mrf.mxu0  ;;  %v697_v31 = vpop.f32.mrf.mxu1 }
  0xec   : > { %v703_v37 = vadd.f32 %v2815_v1, %v2789_v19 }
  0xed   : > { %v517_v39 = vpop.f32.mrf.mxu0  ;;  %v2818_v47 = vpop.f32.mrf.mxu1 }
  0xee   : > { %v698_v48 = vadd.f32 %v697_v31, %v517_v39 }
  0xef   : > { %v2792_v5 = vpop.f32.mrf.mxu0  ;;  %v707_v7 = vpop.f32.mrf.mxu1 }
  0xf0   : > { %v713_v20 = vadd.f32 %v2818_v47, %v2792_v5 }
  0xf1   : > { %v527_v22 = vpop.f32.mrf.mxu0  ;;  %v2821_v29 = vpop.f32.mrf.mxu1 }
  0xf2   : > { %v708_v33 = vadd.f32 %v707_v7, %v527_v22 }
  0xf3   : > { %v2795_v53 = vpop.f32.mrf.mxu0  ;;  %v717_v6 = vpop.f32.mrf.mxu1 }
  0xf4   : > { %v723_v56 = vadd.f32 %v2821_v29, %v2795_v53 }
  0xf5   : > { %v537_v41 = vpop.f32.mrf.mxu0  ;;  %v2824_v57 = vpop.f32.mrf.mxu1 }
  0xf6   : > { %v718_v2 = vadd.f32 %v717_v6, %v537_v41 }
  0xf7   : > { %v2798_v3 = vpop.f32.mrf.mxu0  ;;  %v727_v8 = vpop.f32.mrf.mxu1 }
  0xf8   : > { %v733_v49 = vadd.f32 %v2824_v57, %v2798_v3 }
  0xf9   : > { %v547_v13 = vpop.f32.mrf.mxu0  ;;  %v3774_v18 = vpop.f32.mrf.mxu1 }
  0xfa   : > { %v728_v4 = vadd.f32 %v727_v8, %v547_v13 }
  0xfb   : > { %v2829_v21 = vpop.f32.mrf.mxu0  ;;  %v3776_v24 = vpop.f32.mrf.mxu1 }
  0xfc   : > { %v3778_v54 = vadd.f32 %v2829_v21, %v663_v30 }
  0xfd   : > { %v880_v27 = vpop.f32.mrf.mxu0  ;;  %v3780_v32 = vpop.f32.mrf.mxu1 }
  0xfe   : > { %v3782_v40 = vadd.f32 %v880_v27, %v658_v36 }
  0xff   : > { %v2832_v14 = vpop.f32.mrf.mxu0  ;;  %v3784_v23 = vpop.f32.mrf.mxu1 }
 0x100   : > { %v3786_v28 = vadd.f32 %v2832_v14, %v673_v43 }
 0x101   : > { %v890_v10 = vpop.f32.mrf.mxu0  ;;  %v3788_v11 = vpop.f32.mrf.mxu1 }
 0x102   : > { %v3790_v15 = vadd.f32 %v890_v10, %v668_v50 }
 0x103   : > { %v2835_v12 = vpop.f32.mrf.mxu0  ;;  %v3792_v45 = vpop.f32.mrf.mxu1 }
 0x104   : > { %v3794_v16 = vadd.f32 %v2835_v12, %v683_v55 }
 0x105   : > { %v900_v17 = vpop.f32.mrf.mxu0  ;;  %v3796_v25 = vpop.f32.mrf.mxu1 }
 0x106   : > { %v3798_v26 = vadd.f32 %v900_v17, %v678_v60 }
 0x107   : > { %v2838_v30 = vpop.f32.mrf.mxu0  ;;  %v3800_v34 = vpop.f32.mrf.mxu1 }
 0x108   : > { %v3802_v35 = vadd.f32 %v2838_v30, %v693_v63 }
 0x109   : > { %v910_v36 = vpop.f32.mrf.mxu0  ;;  %v3804_v38 = vpop.f32.mrf.mxu1 }
 0x10a   : > { %v3806_v42 = vadd.f32 %v910_v36, %v688_v9 }
 0x10b   : > { %v2841_v43 = vpop.f32.mrf.mxu0  ;;  %v3808_v44 = vpop.f32.mrf.mxu1 }
 0x10c   : > { %v3810_v46 = vadd.f32 %v2841_v43, %v703_v37 }
 0x10d   : > { %v920_v50 = vpop.f32.mrf.mxu0  ;;  %v3812_v51 = vpop.f32.mrf.mxu1 }
 0x10e   : > { %v3814_v52 = vadd.f32 %v920_v50, %v698_v48 }
 0x10f   : > { %v2844_v55 = vpop.f32.mrf.mxu0  ;;  %v3816_v58 = vpop.f32.mrf.mxu1 }
 0x110   : > { %4093 = vst [vmem:[#allocation2_spill] sm:$0xff] %v3816_v58  ;;  %v3818_v59 = vadd.f32 %v2844_v55, %v713_v20 }
 0x111   : > { %v930_v60 = vpop.f32.mrf.mxu0  ;;  %v3820_v61 = vpop.f32.mrf.mxu1 }
 0x112   : > { %4094 = vst [vmem:[#allocation3_spill] sm:$0xff] %v3820_v61  ;;  %v3822_v62 = vadd.f32 %v930_v60, %v708_v33  ;;  %v1132_v61 = vadd.f32 %v3774_v18, %v3778_v54 }
 0x113   : > { %v2847_v63 = vpop.f32.mrf.mxu0  ;;  %v3824_v0 = vpop.f32.mrf.mxu1 }
 0x114   : > { %4095 = vst [vmem:[#allocation4_spill] sm:$0xff] %v3824_v0  ;;  %v3826_v1 = vadd.f32 %v2847_v63, %v723_v56 }
 0x115   : > { %v940_v9 = vpop.f32.mrf.mxu0  ;;  %v3828_v19 = vpop.f32.mrf.mxu1 }
 0x116   : > { %4096 = vst [vmem:[#allocation5_spill] sm:$0xff] %v3826_v1  ;;  %4097 = vst [vmem:[#allocation6_spill] sm:$0xff] %v3828_v19  ;;  %v3830_v31 = vadd.f32 %v940_v9, %v718_v2 }
 0x117   : > { %v2850_v37 = vpop.f32.mrf.mxu0  ;;  %v3832_v39 = vpop.f32.mrf.mxu1 }
 0x118   : > { %4098 = vst [vmem:[#allocation7_spill] sm:$0xff] %v3830_v31  ;;  %4099 = vst [vmem:[#allocation8_spill] sm:$0xff] %v3832_v39  ;;  %v3834_v47 = vadd.f32 %v2850_v37, %v733_v49 }
 0x119   : > { %v950_v48 = vpop.f32.mrf.mxu0  ;;  %v2907_v5 = vpop.f32.mrf.mxu1 }
 0x11a   : > { %4100 = vst [vmem:[#allocation9_spill] sm:$0xff] %v3834_v47  ;;  %v3836_v7 = vadd.f32 %v950_v48, %v728_v4 }
 0x11b   : > { %v2881_v20 = vpop.f32.mrf.mxu0  ;;  %v1403_v22 = vpop.f32.mrf.mxu1 }
 0x11c   : > { %4101 = vst [vmem:[#allocation10_spill] sm:$0xff] %v3836_v7 }
 0x11d   : > { %v1228_v29 = vpop.f32.mrf.mxu0  ;;  %v3838_v33 = vpop.f32.mrf.mxu1 }
 0x11f   : > { %v2884_v53 = vpop.f32.mrf.mxu0  ;;  %v3840_v6 = vpop.f32.mrf.mxu1 }
 0x121   : > { %v1238_v56 = vpop.f32.mrf.mxu0  ;;  %v3842_v41 = vpop.f32.mrf.mxu1 }
 0x123   : > { %v2887_v57 = vpop.f32.mrf.mxu0  ;;  %v3844_v2 = vpop.f32.mrf.mxu1 }
 0x125   : > { %v3846_v3 = vpop.f32.mrf.mxu0  ;;  %v3848_v8 = vpop.f32.mrf.mxu1 }
 0x127   : > { %v3850_v49 = vpop.f32.mrf.mxu0  ;;  %v3852_v13 = vpop.f32.mrf.mxu1 }
 0x129   : > { %v3854_v4 = vpop.f32.mrf.mxu0  ;;  %v3856_v21 = vpop.f32.mrf.mxu1 }
 0x12a   : > { %4102 = vst [vmem:[#allocation11_spill] sm:$0xff] %v3856_v21 }
 0x12b   : > { %v3858_v27 = vpop.f32.mrf.mxu0  ;;  %v3860_v14 = vpop.f32.mrf.mxu1 }
 0x12c   : > { %4103 = vst [vmem:[#allocation12_spill] sm:$0xff] %v3860_v14  ;;  %v1308_v14 = vadd.f32 %v2881_v20, %v1132_v61  ;;  %v1136_v61 = vadd.f32 %v3788_v11, %v3794_v16  ;;  %v1138_v11 = vadd.f32 %v3796_v25, %v3802_v35 }
 0x12d   : > { %v3862_v10 = vpop.f32.mrf.mxu0  ;;  %v3864_v12 = vpop.f32.mrf.mxu1 }
 0x12e   : > { %4104 = vst [vmem:[#allocation13_spill] sm:$0xff] %v3864_v12  ;;  %v1483_v18 = vadd.f32 %v2907_v5, %v1308_v14 }
 0x12f   : > { %v3866_v17 = vpop.f32.mrf.mxu0  ;;  %v3868_v30 = vpop.f32.mrf.mxu1 }
 0x130   : > { %4105 = vst [vmem:[#allocation14_spill] sm:$0xff] %v3866_v17  ;;  %4106 = vst [vmem:[#allocation15_spill] sm:$0xff] %v3868_v30 }
 0x131   : > { %v3870_v36 = vpop.f32.mrf.mxu0  ;;  %v3872_v43 = vpop.f32.mrf.mxu1 }
 0x132   : > { %4107 = vst [vmem:[#allocation16_spill] sm:$0xff] %v3870_v36  ;;  %4108 = vst [vmem:[#allocation17_spill] sm:$0xff] %v3872_v43  ;;  %v1131_v36 = vadd.f32 %v3776_v24, %v3782_v40 }
 0x133   : > { %v3874_v50 = vpop.f32.mrf.mxu0  ;;  %v3876_v55 = vpop.f32.mrf.mxu1 }
 0x134   : > { %4109 = vst [vmem:[#allocation18_spill] sm:$0xff] %v3874_v50  ;;  %4110 = vst [vmem:[#allocation19_spill] sm:$0xff] %v3876_v55 }
 0x135   : > { %v3878_v60 = vpop.f32.mrf.mxu0  ;;  %v3880_v63 = vpop.f32.mrf.mxu1 }
 0x136   : > { %4111 = vst [vmem:[#allocation20_spill] sm:$0xff] %v3878_v60  ;;  %4112 = vst [vmem:[#allocation21_spill] sm:$0xff] %v3880_v63 }
 0x137   : > { %v3882_v9 = vpop.f32.mrf.mxu0  ;;  %v3884_v37 = vpop.f32.mrf.mxu1 }
 0x138   : > { %4113 = vst [vmem:[#allocation22_spill] sm:$0xff] %v3882_v9  ;;  %4114 = vst [vmem:[#allocation23_spill] sm:$0xff] %v3884_v37 }
 0x139   : > { %v3886_v48 = vpop.f32.mrf.mxu0  ;;  %v2959_v39 = vpop.f32.mrf.mxu1 }
 0x13a   : > { %4115 = vst [vmem:[#allocation24_spill] sm:$0xff] %v3886_v48 }
 0x13b   : > { %v2933_v7 = vpop.f32.mrf.mxu0  ;;  %v1751_v47 = vpop.f32.mrf.mxu1 }
 0x13c   : > { %v1655_v20 = vadd.f32 %v2933_v7, %v1483_v18 }
 0x13d   : > { %v1575_v19 = vpop.f32.mrf.mxu0  ;;  %v2962_v12 = vpop.f32.mrf.mxu1 }
 0x13e   : > { %v1831_v16 = vadd.f32 %v2959_v39, %v1655_v20  ;;  %v1140_v39 = vadd.f32 %v3804_v38, %v3810_v46 }
 0x13f   : > { %v2936_v30 = vpop.f32.mrf.mxu0  ;;  %v1761_v0 = vpop.f32.mrf.mxu1 }
 0x141   : > { %v1585_v43 = vpop.f32.mrf.mxu0  ;;  %v3890_v60 = vpop.f32.mrf.mxu1 }
 0x143   : > { %v2939_v50 = vpop.f32.mrf.mxu0  ;;  %v3896_v37 = vpop.f32.mrf.mxu1 }
 0x144   : > { %4118 = vst [vmem:[#allocation27_spill] sm:$0xff] %v3896_v37 }
 0x145   : > { %v1595_v55 = vpop.f32.mrf.mxu0  ;;  %v3906_v17 = vpop.f32.mrf.mxu1 }
 0x147   : > { %v3888_v31 = vpop.f32.mrf.mxu0 }
 0x149   : > { %v3892_v63 = vpop.f32.mrf.mxu0 }
 0x14a   : > { %4116 = vst [vmem:[#allocation25_spill] sm:$0xff] %v3892_v63  ;;  %v1307_v63 = vadd.f32 %v1228_v29, %v1131_v36 }
 0x14b   : > { %v3894_v9 = vpop.f32.mrf.mxu0 }
 0x14c   : > { %4117 = vst [vmem:[#allocation26_spill] sm:$0xff] %v3894_v9  ;;  %v1134_v9 = vadd.f32 %v3780_v32, %v3786_v28  ;;  %v1482_v24 = vadd.f32 %v1403_v22, %v1307_v63  ;;  %v1135_v32 = vadd.f32 %v3792_v45, %v3798_v26  ;;  %v1137_v45 = vadd.f32 %v3800_v34, %v3806_v42 }
 0x14d   : > { %v3898_v48 = vpop.f32.mrf.mxu0 }
 0x14e   : > { %4119 = vst [vmem:[#allocation28_spill] sm:$0xff] %v3898_v48  ;;  %v1133_v48 = vadd.f32 %v3784_v23, %v3790_v15  ;;  %v1310_v54 = vadd.f32 %v2884_v53, %v1134_v9  ;;  %v1654_v28 = vadd.f32 %v1575_v19, %v1482_v24  ;;  %v1312_v15 = vadd.f32 %v2887_v57, %v1136_v61  ;;  %v4124_v61 = vld [vmem:[#allocation11_spill] sm:$0xff] }
 0x14f   : > { %v3902_v1 = vpop.f32.mrf.mxu0  ;;  %v1314_v57 = vadd.f32 %v3850_v49, %v1138_v11  ;;  %v1313_v25 = vadd.f32 %v3854_v4, %v1137_v45 }
 0x150   : > { %4120 = vst [vmem:[#allocation29_spill] sm:$0xff] %v3902_v1  ;;  %v3916_v1 = vpop.f32.mrf.mxu1  ;;  %v1309_v40 = vadd.f32 %v1238_v56, %v1133_v48  ;;  %v1485_v23 = vadd.f32 %v3838_v33, %v1310_v54  ;;  %v1311_v56 = vadd.f32 %v3846_v3, %v1135_v32  ;;  %v1830_v26 = vadd.f32 %v1751_v47, %v1654_v28  ;;  %v4125_v32 = vld [vmem:[#allocation14_spill] sm:$0xff] }
 0x151   : > { %v3908_v21 = vpop.f32.mrf.mxu0  ;;  %v1487_v33 = vadd.f32 %v3842_v41, %v1312_v15  ;;  %v1139_v47 = vadd.f32 %v3808_v44, %v3814_v52  ;;  %v1489_v9 = vadd.f32 %v3848_v8, %v1314_v57  ;;  %v1488_v38 = vadd.f32 %v3852_v13, %v1313_v25  ;;  %v4123_v24 = vld [vmem:[#allocation25_spill] sm:$0xff]  ;;  %v4132_v57 = vld [vmem:[#allocation4_spill] sm:$0xff] }
 0x152   : > { %v3927_v5 = vpop.f32.mrf.mxu1  ;;  %v1484_v22 = vadd.f32 %v3840_v6, %v1309_v40  ;;  %v1657_v7 = vadd.f32 %v2936_v30, %v1485_v23  ;;  %v1486_v3 = vadd.f32 %v3844_v2, %v1311_v56  ;;  %v1316_v2 = vadd.f32 %v3858_v27, %v1140_v39  ;;  %v4121_v27 = vld [vmem:[#allocation2_spill] sm:$0xff]  ;;  %v4134_v39 = vld [vmem:[#allocation13_spill] sm:$0xff] }
 0x153   : > { %v3912_v37 = vpop.f32.mrf.mxu0  ;;  %v1659_v34 = vadd.f32 %v2939_v50, %v1487_v33  ;;  %v1315_v46 = vadd.f32 %v3862_v10, %v1139_v47  ;;  %v1142_v44 = vadd.f32 %v3812_v51, %v3818_v59  ;;  %v1141_v50 = vadd.f32 %v4121_v27, %v3822_v62  ;;  %v4128_v62 = vld [vmem:[#allocation5_spill] sm:$0xff]  ;;  %v4130_v45 = vld [vmem:[#allocation26_spill] sm:$0xff]  ;;  %v4131_v33 = vld [vmem:[#allocation7_spill] sm:$0xff] }
 0x154   : > { %v1656_v19 = vadd.f32 %v1585_v43, %v1484_v22  ;;  %v3939_v36 = vpop.f32.mrf.mxu1  ;;  %v1833_v30 = vadd.f32 %v2962_v12, %v1657_v7  ;;  %v1658_v49 = vadd.f32 %v1595_v55, %v1486_v3  ;;  %v4122_v55 = vld [vmem:[#allocation27_spill] sm:$0xff]  ;;  %v1660_v10 = vadd.f32 %v4123_v24, %v1488_v38  ;;  %v4127_v22 = vld [vmem:[#allocation16_spill] sm:$0xff]  ;;  %v4143_v24 = vld [vmem:[#allocation17_spill] sm:$0xff] }
 0x155   : > { %v3918_v58 = vpop.f32.mrf.mxu0  ;;  %v1835_v52 = vadd.f32 %v3890_v60, %v1659_v34  ;;  %v1491_v20 = vadd.f32 %v4124_v61, %v1316_v2  ;;  %v1318_v28 = vadd.f32 %v4125_v32, %v1142_v44  ;;  %v1317_v56 = vadd.f32 %v4127_v22, %v1141_v50  ;;  %v4133_v3 = vld [vmem:[#allocation28_spill] sm:$0xff]  ;;  %v4135_v34 = vld [vmem:[#allocation18_spill] sm:$0xff] }
 0x156   : > { %v1832_v41 = vadd.f32 %v1761_v0, %v1656_v19  ;;  %v3949_v48 = vpop.f32.mrf.mxu1  ;;  %v1661_v0 = vadd.f32 %v3888_v31, %v1489_v9  ;;  %v1834_v13 = vadd.f32 %v4122_v55, %v1658_v49  ;;  %v4126_v31 = vld [vmem:[#allocation12_spill] sm:$0xff] }
 0x157   : > { %v3922_v29 = vpop.f32.mrf.mxu0  ;;  %v1490_v15 = vadd.f32 %v4126_v31, %v1315_v46  ;;  %v4137_v2 = vld [vmem:[#allocation20_spill] sm:$0xff] }
 0x158   : > { %v1801_v51 = vpop.f32.mrf.mxu1 }
 0x159   : > { %v3929_v53 = vpop.f32.mrf.mxu0  ;;  %v1662_v25 = vadd.f32 %v4133_v3, %v1490_v15 }
 0x15a   : > { %v2977_v47 = vpop.f32.mrf.mxu1 }
 0x15b   : > { %v2985_v14 = vpop.f32.mrf.mxu0  ;;  %v1838_v50 = vadd.f32 %v3939_v36, %v1662_v25 }
 0x15c   : > { %v2006_v6 = vadd.f32 %v2985_v14, %v1831_v16  ;;  %v4129_v16 = vld [vmem:[#allocation3_spill] sm:$0xff]  ;;  %v1837_v14 = vadd.f32 %v3906_v17, %v1661_v0  ;;  %v4141_v0 = vld [vmem:[#allocation10_spill] sm:$0xff] }
 0x15d   : > { %v1926_v63 = vpop.f32.mrf.mxu0  ;;  %v1144_v7 = vadd.f32 %v4129_v16, %v4128_v62  ;;  %v4147_v16 = vld [vmem:[#allocation21_spill] sm:$0xff] }
 0x15e   : > { %v2005_v35 = vadd.f32 %v1926_v63, %v1830_v26  ;;  %v2022_v4 = vmax.f32 %v2006_v6, 0.0  ;;  %v1663_v26 = vadd.f32 %v4130_v45, %v1491_v20  ;;  %v1143_v6 = vadd.f32 %v4132_v57, %v4131_v33  ;;  %v1811_v20 = vpop.f32.mrf.mxu1  ;;  %v4148_v33 = vld [vmem:[#allocation23_spill] sm:$0xff] }
 0x15f   : > { %v2988_v42 = vpop.f32.mrf.mxu0  ;;  %v1836_v63 = vadd.f32 %v3916_v1, %v1660_v10  ;;  %v4139_v1 = vld [vmem:[#allocation6_spill] sm:$0xff] }
 0x160   : > { %v2021_v43 = vmax.f32 %v2005_v35, 0.0  ;;  %v2008_v18 = vadd.f32 %v2988_v42, %v1833_v30  ;;  %v1493_v30 = vadd.f32 %v4134_v39, %v1318_v28  ;;  %v1320_v42 = vadd.f32 %v4135_v34, %v1144_v7 }
 0x161   : > { %v1936_v54 = vpop.f32.mrf.mxu0  ;;  %v1839_v46 = vadd.f32 %v3927_v5, %v1663_v26 }
 0x162   : > { %v2007_v12 = vadd.f32 %v1936_v54, %v1832_v41  ;;  %3009 = vmatprep.mubr.msk.f32.mxu1 %vm2038_vm4, %v2021_v43  ;;  %v2024_v59 = vmax.f32 %v2008_v18, 0.0  ;;  %v4136_v43 = vld [vmem:[#allocation15_spill] sm:$0xff]  ;;  %v4138_v54 = vld [vmem:[#allocation9_spill] sm:$0xff]  ;;  %v1495_v10 = vadd.f32 %v4143_v24, %v1320_v42 }
 0x163   : > { %v2991_v8 = vpop.f32.mrf.mxu0  ;;  %3010 = vmatmul.mubr.msk.f32.vlgmr.msra.gmra.mxu1 %vm2038_vm4, %v2022_v4  ;;  %v1492_v9 = vadd.f32 %v4136_v43, %v1317_v56  ;;  %v1319_v4 = vadd.f32 %v4137_v2, %v1143_v6  ;;  %v1146_v38 = vadd.f32 %v4139_v1, %v4138_v54 }
 0x164   : > { %v2023_v40 = vmax.f32 %v2007_v12, 0.0  ;;  %v2010_v60 = vadd.f32 %v2991_v8, %v1835_v52  ;;  %v4140_v12 = vld [vmem:[#allocation29_spill] sm:$0xff]  ;;  %v4142_v8 = vld [vmem:[#allocation8_spill] sm:$0xff] }
 0x165   : > { %v1946_v23 = vpop.f32.mrf.mxu0  ;;  %v1665_v44 = vadd.f32 %v4140_v12, %v1493_v30  ;;  %v1145_v27 = vadd.f32 %v4142_v8, %v4141_v0  ;;  %v1664_v55 = vadd.f32 %v3908_v21, %v1492_v9  ;;  %v1667_v21 = vadd.f32 %v3912_v37, %v1495_v10  ;;  %v2253_v10 = vld [vmem:[%s4018_s10 + $0x28] sm:$0xff] }
 0x166   : > { %v2009_v11 = vadd.f32 %v1946_v23, %v1834_v13  ;;  %3012 = vmatprep.mubr.msk.f32.mxu1 %vm2038_vm4, %v2023_v40  ;;  %v2026_v41 = vmax.f32 %v2010_v60, 0.0  ;;  %v4144_v40 = vld [vmem:[#allocation22_spill] sm:$0xff]  ;;  %v4146_v23 = vld [vmem:[#allocation24_spill] sm:$0xff] }
 0x167   : > { %v2994_v19 = vpop.f32.mrf.mxu0  ;;  %3013 = vmatmul.mubr.msk.f32.gmra.mxu1 %vm2038_vm4, %v2024_v59  ;;  %v1322_v61 = vadd.f32 %v4144_v40, %v1146_v38  ;;  %v4145_v59 = vld [vmem:[#allocation19_spill] sm:$0xff]  ;;  %v1321_v31 = vadd.f32 %v4146_v23, %v1145_v27  ;;  %v1841_v36 = vadd.f32 %v3949_v48, %v1665_v44  ;;  %v1840_v56 = vadd.f32 %v1801_v51, %v1664_v55  ;;  %v2248_v38 = vld [vmem:[%s4018_s10] sm:$0xff] }
 0x168   : > { %v2025_v35 = vmax.f32 %v2009_v11, 0.0  ;;  %v2012_v17 = vadd.f32 %v2994_v19, %v1837_v14  ;;  %v1494_v60 = vadd.f32 %v4145_v59, %v1319_v4  ;;  %v2980_v14 = vpop.f32.mrf.mxu1  ;;  %v1843_v48 = vadd.f32 %v2977_v47, %v1667_v21 }
 0x169   : > { %v1956_v49 = vpop.f32.mrf.mxu0  ;;  %v1497_v7 = vadd.f32 %v4147_v16, %v1322_v61  ;;  %v1496_v57 = vadd.f32 %v4148_v33, %v1321_v31  ;;  %v2259_v33 = vld [vmem:[%s4018_s10 + $0x58] sm:$0xff] }
 0x16a   : > { %v2011_v18 = vadd.f32 %v1956_v49, %v1836_v63  ;;  %3015 = vmatprep.mubr.msk.f32.mxu1 %vm2038_vm4, %v2025_v35  ;;  %v2028_v32 = vmax.f32 %v2012_v17, 0.0  ;;  %v1666_v11 = vadd.f32 %v3918_v58, %v1494_v60  ;;  %v1821_v25 = vpop.f32.mrf.mxu1  ;;  %v2255_v60 = vld [vmem:[%s4018_s10 + $0x38] sm:$0xff] }
 0x16b   : > { %v2997_v52 = vpop.f32.mrf.mxu0  ;;  %3016 = vmatmul.mubr.msk.f32.gmra.mxu1 %vm2038_vm4, %v2026_v41  ;;  %v1669_v37 = vadd.f32 %v3922_v29, %v1497_v7  ;;  %v1668_v58 = vadd.f32 %v3929_v53, %v1496_v57 }
 0x16c   : > { %v2027_v13 = vmax.f32 %v2011_v18, 0.0  ;;  %v2014_v5 = vadd.f32 %v2997_v52, %v1839_v46  ;;  %v1842_v51 = vadd.f32 %v1811_v20, %v1666_v11  ;;  %v2249_v18 = vld [vmem:[%s4018_s10 + $0x8] sm:$0xff]  ;;  %v2251_v52 = vld [vmem:[%s4018_s10 + $0x18] sm:$0xff] }
 0x16d   : > { %v1966_v28 = vpop.f32.mrf.mxu0  ;;  %v1845_v42 = vadd.f32 %v2980_v14, %v1669_v37  ;;  %v1844_v29 = vadd.f32 %v1821_v25, %v1668_v58  ;;  %v2257_v11 = vld [vmem:[%s4018_s10 + $0x48] sm:$0xff]  ;;  %v2256_v14 = vld [vmem:[%s4018_s10 + $0x40] sm:$0xff]  ;;  %v2258_v37 = vld [vmem:[%s4018_s10 + $0x50] sm:$0xff] }
 0x16e   : > { %v2013_v15 = vadd.f32 %v1966_v28, %v1838_v50  ;;  %3018 = vmatprep.mubr.msk.f32.mxu1 %vm2038_vm4, %v2027_v13  ;;  %v2030_v45 = vmax.f32 %v2014_v5, 0.0  ;;  %v2250_v50 = vld [vmem:[%s4018_s10 + $0x10] sm:$0xff] }
 0x16f   : > { %v3000_v22 = vpop.f32.mrf.mxu0  ;;  %3019 = vmatmul.mubr.msk.f32.gmra.mxu1 %vm2038_vm4, %v2028_v32  ;;  %v2252_v32 = vld [vmem:[%s4018_s10 + $0x20] sm:$0xff] }
 0x170   : > { %v2029_v62 = vmax.f32 %v2013_v15, 0.0  ;;  %v2016_v26 = vadd.f32 %v3000_v22, %v1841_v36  ;;  %v2254_v36 = vld [vmem:[%s4018_s10 + $0x30] sm:$0xff] }
 0x171   : > { %v1976_v19 = vpop.f32.mrf.mxu0 }
 0x172   : > { %v2015_v6 = vadd.f32 %v1976_v19, %v1840_v56  ;;  %3021 = vmatprep.mubr.msk.f32.mxu1 %vm2038_vm4, %v2029_v62  ;;  %v2032_v35 = vmax.f32 %v2016_v26, 0.0 }
 0x173   : > { %v3003_v63 = vpop.f32.mrf.mxu0  ;;  %3022 = vmatmul.mubr.msk.f32.gmra.mxu1 %vm2038_vm4, %v2030_v45 }
 0x174   : > { %v2031_v3 = vmax.f32 %v2015_v6, 0.0  ;;  %v2018_v39 = vadd.f32 %v3003_v63, %v1843_v48 }
 0x175   : > { %v1986_v30 = vpop.f32.mrf.mxu0 }
 0x176   : > { %v2017_v34 = vadd.f32 %v1986_v30, %v1842_v51  ;;  %3024 = vmatprep.mubr.msk.f32.mxu1 %vm2038_vm4, %v2031_v3  ;;  %v2034_v17 = vmax.f32 %v2018_v39, 0.0  ;;  %v2261_v3 = vld [vmem:[%s4018_s10 + $0x68] sm:$0xff]  ;;  %v2260_v30 = vld [vmem:[%s4018_s10 + $0x60] sm:$0xff] }
 0x177   : > { %v3006_v47 = vpop.f32.mrf.mxu0  ;;  %3025 = vmatmul.mubr.msk.f32.gmra.mxu1 %vm2038_vm4, %v2032_v35 }
 0x178   : > { %v2033_v41 = vmax.f32 %v2017_v34, 0.0  ;;  %v2020_v49 = vadd.f32 %v3006_v47, %v1845_v42 }
 0x179   : > { %v1996_v53 = vpop.f32.mrf.mxu0 }
 0x17a   : > { %v2019_v43 = vadd.f32 %v1996_v53, %v1844_v29  ;;  %3027 = vmatprep.mubr.msk.f32.mxu1 %vm2038_vm4, %v2033_v41  ;;  %v2036_v2 = vmax.f32 %v2020_v49, 0.0  ;;  %v2263_v29 = vld [vmem:[%s4018_s10 + $0x78] sm:$0xff]  ;;  %v2262_v53 = vld [vmem:[%s4018_s10 + $0x70] sm:$0xff] }
 0x17b   : > { %3028 = vmatmul.mubr.msk.f32.gmra.mxu1 %vm2038_vm4, %v2034_v17 }
 0x17c   : > { %v2035_v9 = vmax.f32 %v2019_v43, 0.0 }
 0x17e   : > { %3030 = vmatprep.mubr.msk.f32.mxu1 %vm2038_vm4, %v2035_v9 }
 0x17f   : > { %3031 = vmatmul.mubr.msk.f32.gmra.mxu1 %vm2038_vm4, %v2036_v2 }
 0x223   : > { %v3011_v4 = vpop.f32.mrf.mxu1 }
 0x224   : > { %v2233_v54 = vmax.f32 %v3011_v4, 0.0 }
 0x225   : > { %v2153_v1 = vpop.f32.mrf.mxu1 }
 0x226   : > { %v2265_v46 = vadd.f32 %v2249_v18, %v2233_v54  ;;  %v2232_v12 = vmax.f32 %v2153_v1, 0.0 }
 0x227   : > { %v3014_v44 = vpop.f32.mrf.mxu1 }
 0x228   : > { %2281 = vst.msk [vmem:[%s4024_s12 + $0x8] sm:$0xff] %vm374_vm1, %v2265_v46  ;;  %v2264_v0 = vadd.f32 %v2248_v38, %v2232_v12  ;;  %v2235_v8 = vmax.f32 %v3014_v44, 0.0 }
 0x229   : > { %v2163_v27 = vpop.f32.mrf.mxu1 }
 0x22a   : > { %2280 = vst.msk [vmem:[%s4024_s12] sm:$0xff] %vm374_vm1, %v2264_v0  ;;  %v2267_v55 = vadd.f32 %v2251_v52, %v2235_v8  ;;  %v2234_v13 = vmax.f32 %v2163_v27, 0.0 }
 0x22b   : > { %v3017_v24 = vpop.f32.mrf.mxu1 }
 0x22c   : > { %2283 = vst.msk [vmem:[%s4024_s12 + $0x18] sm:$0xff] %vm374_vm1, %v2267_v55  ;;  %v2266_v40 = vadd.f32 %v2250_v50, %v2234_v13  ;;  %v2237_v61 = vmax.f32 %v3017_v24, 0.0 }
 0x22d   : > { %v2173_v20 = vpop.f32.mrf.mxu1 }
 0x22e   : > { %2282 = vst.msk [vmem:[%s4024_s12 + $0x10] sm:$0xff] %vm374_vm1, %v2266_v40  ;;  %v2269_v5 = vadd.f32 %v2253_v10, %v2237_v61  ;;  %v2236_v28 = vmax.f32 %v2173_v20, 0.0 }
 0x22f   : > { %v3020_v59 = vpop.f32.mrf.mxu1 }
 0x230   : > { %2285 = vst.msk [vmem:[%s4024_s12 + $0x28] sm:$0xff] %vm374_vm1, %v2269_v5  ;;  %v2268_v23 = vadd.f32 %v2252_v32, %v2236_v28  ;;  %v2239_v31 = vmax.f32 %v3020_v59, 0.0 }
 0x231   : > { %v2183_v15 = vpop.f32.mrf.mxu1 }
 0x232   : > { %2284 = vst.msk [vmem:[%s4024_s12 + $0x20] sm:$0xff] %vm374_vm1, %v2268_v23  ;;  %v2271_v21 = vadd.f32 %v2255_v60, %v2239_v31  ;;  %v2238_v22 = vmax.f32 %v2183_v15, 0.0 }
 0x233   : > { %v3023_v56 = vpop.f32.mrf.mxu1 }
 0x234   : > { %2287 = vst.msk [vmem:[%s4024_s12 + $0x38] sm:$0xff] %vm374_vm1, %v2271_v21  ;;  %v2270_v62 = vadd.f32 %v2254_v36, %v2238_v22  ;;  %v2241_v16 = vmax.f32 %v3023_v56, 0.0 }
 0x235   : > { %v2193_v7 = vpop.f32.mrf.mxu1 }
 0x236   : > { %2286 = vst.msk [vmem:[%s4024_s12 + $0x30] sm:$0xff] %vm374_vm1, %v2270_v62  ;;  %v2273_v45 = vadd.f32 %v2257_v11, %v2241_v16  ;;  %v2240_v26 = vmax.f32 %v2193_v7, 0.0 }
 0x237   : > { %v3026_v19 = vpop.f32.mrf.mxu1 }
 0x238   : > { %2289 = vst.msk [vmem:[%s4024_s12 + $0x48] sm:$0xff] %vm374_vm1, %v2273_v45  ;;  %v2272_v57 = vadd.f32 %v2256_v14, %v2240_v26  ;;  %v2243_v6 = vmax.f32 %v3026_v19, 0.0 }
 0x239   : > { %v2203_v48 = vpop.f32.mrf.mxu1 }
 0x23a   : > { %2288 = vst.msk [vmem:[%s4024_s12 + $0x40] sm:$0xff] %vm374_vm1, %v2272_v57  ;;  %v2275_v63 = vadd.f32 %v2259_v33, %v2243_v6  ;;  %v2242_v51 = vmax.f32 %v2203_v48, 0.0 }
 0x23b   : > { %v3029_v58 = vpop.f32.mrf.mxu1 }
 0x23c   : > { %2291 = vst.msk [vmem:[%s4024_s12 + $0x58] sm:$0xff] %vm374_vm1, %v2275_v63  ;;  %v2274_v25 = vadd.f32 %v2258_v37, %v2242_v51  ;;  %v2245_v35 = vmax.f32 %v3029_v58, 0.0 }
 0x23d   : > { %v2213_v39 = vpop.f32.mrf.mxu1 }
 0x23e   : > { %2290 = vst.msk [vmem:[%s4024_s12 + $0x50] sm:$0xff] %vm374_vm1, %v2274_v25  ;;  %v2277_v34 = vadd.f32 %v2261_v3, %v2245_v35  ;;  %v2244_v42 = vmax.f32 %v2213_v39, 0.0 }
 0x23f   : > { %v3032_v47 = vpop.f32.mrf.mxu1 }
 0x240   : > { %2293 = vst.msk [vmem:[%s4024_s12 + $0x68] sm:$0xff] %vm374_vm1, %v2277_v34  ;;  %v2276_v41 = vadd.f32 %v2260_v30, %v2244_v42  ;;  %v2247_v17 = vmax.f32 %v3032_v47, 0.0 }
 0x241   : > { %v2223_v49 = vpop.f32.mrf.mxu1 }
 0x242   : > { %2292 = vst.msk [vmem:[%s4024_s12 + $0x60] sm:$0xff] %vm374_vm1, %v2276_v41  ;;  %v2279_v43 = vadd.f32 %v2263_v29, %v2247_v17  ;;  %v2246_v9 = vmax.f32 %v2223_v49, 0.0 }
 0x244   : > { %2295 = vst.msk [vmem:[%s4024_s12 + $0x78] sm:$0xff] %vm374_vm1, %v2279_v43  ;;  %v2278_v2 = vadd.f32 %v2262_v53, %v2246_v9 }
 0x246   : > { %2294 = vst.msk [vmem:[%s4024_s12 + $0x70] sm:$0xff] %vm374_vm1, %v2278_v2 }
 0x247 PF: > { %s14_s19 = sadd.s32 1, %s3112_s19   ;;  %s4149_s15 = smov %s3104_s17 }
 0x248   : > { %p11_p8 = scmp.ge.s32.totalorder %s14_s19, 6   ;;  %s4150_s16 = smov %s3108_s18 }
 0x249   : > { %s4151_s17 = smov %s4154_s20  ;;  %s4152_s18 = smov %s4158_s21 }
 0x24a   :  { %13 = sbr.rel (!%p11_p8) target bundleno = 3 (0x3), region = 77 }

</bundles_post_ra>
